<compile_context>
chip_gen: v7x
topology: tpu7x:2x2x1
jax: 0.10.0
libtpu: 0.0.40
codegen_flags: <defaults>
</compile_context>

<pallas_src>
import functools

import jax
import jax.numpy as jnp
from jax.experimental import pallas as pl
from jax.experimental.pallas import tpu as pltpu

IN_FEATURES = 819
OUT_FEATURES = 20
N_PAD = 128   # 20 -> full 128-lane output (unmasked, lane-dense vst)


def _round_up(x, m):
    return (x + m - 1) // m * m


def linear_kernel(x_ref, w_ref, b_ref, o_ref, *, precision):
    # x_ref: (tb, 819)  w_ref: (819, 128)  b_ref: (1, 128)  o_ref: (tb, 128)
    acc = jax.lax.dot_general(
        x_ref[...], w_ref[...],
        dimension_numbers=(((1,), (0,)), ((), ())),
        preferred_element_type=jnp.float32,
        precision=precision,
    )
    o_ref[...] = (acc + b_ref[...]).astype(o_ref.dtype)


def prepare_params(weight, bias, dtype=jnp.float32):
    """One-time parameter prep (outside the forward hot path).

    weight: (20, 819) PyTorch layout; bias: (20,).
    Returns weight transposed to (819, 128) (K unpadded, N zero-padded to 128
    so the output store is lane-dense) and bias as (1, 128) f32.
    Pass dtype=jnp.bfloat16 for the reduced-HBM input path.
    """
    w_t = jnp.zeros((IN_FEATURES, N_PAD), dtype)
    w_t = w_t.at[:, :OUT_FEATURES].set(weight.T.astype(dtype))
    b2d = jnp.zeros((1, N_PAD), jnp.float32)
    b2d = b2d.at[:, :OUT_FEATURES].set(bias.astype(jnp.float32))
    return w_t, b2d


def _choose_tb(batch, cap):
    """Batch tile: multiple of 8 (or the full batch when it is tiny), sized so
    large batches get >= 4 grid steps (v7x megacore) up to `cap` rows."""
    if batch < 8:
        return batch                      # full-extent block: always legal
    tb = _round_up(pl.cdiv(batch, 4), 8)  # aim for >= 4 grid steps
    return int(min(cap, max(8, tb)))


def neural_network_forward(x, w_pad, b_pad, *, block_b_cap=2048):
    """x: (B, 819); w_pad: (819, 128) from prepare_params; b_pad: (1, 128)."""
    B = x.shape[0]
    in_dtype = w_pad.dtype
    xk = x if x.dtype == in_dtype else x.astype(in_dtype)

    tb = _choose_tb(B, block_b_cap)
    grid = pl.cdiv(B, tb)

    # True f32 matmul when operands are f32 (matches PyTorch numerics);
    # bf16 operands take the fast single-pass path with f32 accumulation.
    precision = (jax.lax.Precision.HIGHEST if in_dtype == jnp.float32
                 else jax.lax.Precision.DEFAULT)

    itemsize = jnp.dtype(in_dtype).itemsize
    cost = pl.CostEstimate(
        flops=2 * B * IN_FEATURES * N_PAD,        # padded-N matmul flops
        transcendentals=0,
        bytes_accessed=(B * IN_FEATURES * itemsize        # x read (dominant)
                        + IN_FEATURES * N_PAD * itemsize  # w (resident, once)
                        + N_PAD * 4                       # bias
                        + B * N_PAD * 4),                 # f32 output write
    )

    out = pl.pallas_call(
        functools.partial(linear_kernel, precision=precision),
        out_shape=jax.ShapeDtypeStruct((B, N_PAD), jnp.float32),
        grid=(grid,),
        in_specs=[
            pl.BlockSpec((tb, IN_FEATURES), lambda i: (i, 0)),       # x streamed
            pl.BlockSpec((IN_FEATURES, N_PAD), lambda i: (0, 0)),    # w resident
            pl.BlockSpec((1, N_PAD), lambda i: (0, 0)),              # b resident
        ],
        out_specs=pl.BlockSpec((tb, N_PAD), lambda i: (i, 0)),
        compiler_params=pltpu.CompilerParams(
            dimension_semantics=("parallel",),        # megacore sharding on v7x
            vmem_limit_bytes=48 * 1024 * 1024,        # large f32 tiles on v5e too
        ),
        cost_estimate=cost,
    )(xk, w_pad, b_pad)

    # Slice away the 20 -> 128 output-lane padding (and any partial-block rows
    # never exist in HBM since out_shape is exactly (B, 128)).
    return out[:, :OUT_FEATURES]


def init_params(key):
    """Matches the PyTorch module:
    weight ~ Normal(0, 0.01) (explicit torch.nn.init.normal_),
    bias ~ Uniform(-1/sqrt(in_features), 1/sqrt(in_features)) (nn.Linear default)."""
    kw, kb = jax.random.split(key)
    weight = 0.01 * jax.random.normal(kw, (OUT_FEATURES, IN_FEATURES), jnp.float32)
    bound = 1.0 / jnp.sqrt(jnp.float32(IN_FEATURES))
    bias = jax.random.uniform(kb, (OUT_FEATURES,), jnp.float32,
                              minval=-bound, maxval=bound)
    return weight, bias


if __name__ == "__main__":
    key = jax.random.PRNGKey(0)
    k_x, k_p = jax.random.split(key)

    weight, bias = init_params(k_p)
    # One-time param prep (transpose + N-pad); forward path has no host copies.
    w_pad, b_pad = prepare_params(weight, bias, dtype=jnp.float32)

    def ref_fn(xx):
        return jnp.dot(xx, weight.T, precision=jax.lax.Precision.HIGHEST) + bias

    # Small batch, single block.
    B = 8
    x = jax.random.normal(k_x, (B, IN_FEATURES), jnp.float32)
    logits = jax.block_until_ready(neural_network_forward(x, w_pad, b_pad))
    assert logits.shape == (B, OUT_FEATURES)
    assert jnp.allclose(logits, ref_fn(x), atol=1e-4, rtol=1e-4)

    # Non-divisible batch exercises the partial last block (masked stores).
    B2 = 13
    x2 = jax.random.normal(jax.random.PRNGKey(1), (B2, IN_FEATURES), jnp.float32)
    logits2 = jax.block_until_ready(neural_network_forward(x2, w_pad, b_pad))
    assert logits2.shape == (B2, OUT_FEATURES)
    assert jnp.allclose(logits2, ref_fn(x2), atol=1e-4, rtol=1e-4)

    print("KERNEL_OK")
</pallas_src>

<mosaic_0001>
module attributes {stable_mosaic.version = 11 : i64} {
  func.func @linear_kernel(%arg0: i32, %arg1: memref<8x819xf32, #tpu.memory_space<vmem>>, %arg2: memref<819x128xf32, #tpu.memory_space<vmem>>, %arg3: memref<1x128xf32, #tpu.memory_space<vmem>>, %arg4: memref<8x128xf32, #tpu.memory_space<vmem>>) attributes {dimension_semantics = [#tpu.dimension_semantics<parallel>], iteration_bounds = array<i64: 1>, scalar_prefetch = 0 : i64, scratch_operands = 0 : i64, tpu.core_type = #tpu.core_type<tc>, window_params = [{transform_indices = @transform_0, window_bounds = array<i64: 8, 819>}, {pipeline_mode = #tpu.pipeline_mode<synchronous>, transform_indices = @transform_1, window_bounds = array<i64: 819, 128>}, {pipeline_mode = #tpu.pipeline_mode<synchronous>, transform_indices = @transform_2, window_bounds = array<i64: 1, 128>}, {transform_indices = @transform_3, window_bounds = array<i64: 8, 128>}]} {
    %c0 = arith.constant 0 : index
    %c0_0 = arith.constant 0 : index
    %0 = vector.load %arg1[%c0, %c0_0] : memref<8x819xf32, #tpu.memory_space<vmem>>, vector<8x819xf32>
    %c0_1 = arith.constant 0 : index
    %c0_2 = arith.constant 0 : index
    %1 = vector.load %arg2[%c0_1, %c0_2] : memref<819x128xf32, #tpu.memory_space<vmem>>, vector<819x128xf32>
    %cst = arith.constant dense<0.000000e+00> : vector<8x128xf32>
    %2 = tpu.matmul %0, %1, %cst {dimension_numbers = #tpu.dot_dimension_numbers<[1], [0], [0], [1], [0, 0, 1, 1], [], []>, precision = #tpu.contract_precision<fp32>} : vector<8x819xf32>, vector<819x128xf32>, vector<8x128xf32> -> vector<8x128xf32>
    %c0_3 = arith.constant 0 : index
    %c0_4 = arith.constant 0 : index
    %3 = vector.load %arg3[%c0_3, %c0_4] : memref<1x128xf32, #tpu.memory_space<vmem>>, vector<1x128xf32>
    %4 = vector.broadcast %3 : vector<1x128xf32> to vector<8x128xf32>
    %5 = arith.addf %2, %4 : vector<8x128xf32>
    %c0_5 = arith.constant 0 : index
    %c0_6 = arith.constant 0 : index
    %6 = vector.load %arg4[%c0_5, %c0_6] : memref<8x128xf32, #tpu.memory_space<vmem>>, vector<8x128xf32>
    tpu.vector_store %arg4[%c0_5, %c0_6], %5 {strides = array<i32>} : memref<8x128xf32, #tpu.memory_space<vmem>>, vector<8x128xf32>,
    return
  }
  func.func @transform_0(%arg0: i32) -> (i32, i32) {
    %c0_i32 = arith.constant 0 : i32
    %c0_i32_0 = arith.constant 0 : i32
    return %arg0, %c0_i32 : i32, i32
  }
  func.func @transform_1(%arg0: i32) -> (i32, i32) {
    %c0_i32 = arith.constant 0 : i32
    %c0_i32_0 = arith.constant 0 : i32
    %c0_i32_1 = arith.constant 0 : i32
    return %c0_i32, %c0_i32_0 : i32, i32
  }
  func.func @transform_2(%arg0: i32) -> (i32, i32) {
    %c0_i32 = arith.constant 0 : i32
    %c0_i32_0 = arith.constant 0 : i32
    %c0_i32_1 = arith.constant 0 : i32
    return %c0_i32, %c0_i32_0 : i32, i32
  }
  func.func @transform_3(%arg0: i32) -> (i32, i32) {
    %c0_i32 = arith.constant 0 : i32
    %c0_i32_0 = arith.constant 0 : i32
    return %arg0, %c0_i32 : i32, i32
  }
}

</mosaic_0001>

<bundles_post_ra>
// kernel: tpu_custom_call.1
= control target key start
LH: loop header
LB: loop body
LE: loop exit
PB: predicated region body
PF: predicated region fallthrough
CT: control target
= control target key end

     0   :  { %8 = vsyncpa [#allocation3], 0  ;;  %s6481_s0 = inlined_call_operand.hbm [shape: f32[8,819], index: 0, kind: input, shape index: {}]   ;;  %s6482_s1 = inlined_call_operand.hbm [shape: f32[819,128], index: 1, kind: input, shape index: {}]   ;;  %s6483_s2 = inlined_call_operand.vmem [shape: f32[1,128], index: 2, kind: input, shape index: {}]   ;;  %s6484_s3 = inlined_call_operand.hbm [shape: f32[8,128], index: 3, kind: output, shape index: {}]  }
   0x1   :  { %9 = vsyncpa [#allocation6], 0 }
   0x2   :  { %10 = vsyncpa [#allocation4], 0  ;;  %s4794_s12 = smov [#allocation2]   ;;  %s4795_s14 = smov [#allocation5]  }
   0x3   :  { %s17_s13 = sshll.u32 %s4794_s12, 4  ;;  %s26_s15 = sshll.u32 %s4795_s14, 4  ;;  %s18_s13 = int_to_ptr.vmem [resolvable:$true] %s17_s13  ;;  %s4822_s15 = int_to_ptr.vmem [resolvable:$true] %s26_s15 }
   0x4   :  { %s4722_s18 = scalar_lea.hbm %s6481_s0, 896 }
   0x5   :  { %p4723_p0 = scmp.ne.s32.totalorder %s6481_s0, %s4722_s18  ;;  %p4726_p1 = scmp.lt.u32.totalorder %s4722_s18, %s6481_s0 }
   0x7   :  { %p4728_p2 = pnand %p4726_p1, %p4723_p0 }
   0x9   :  { %4731 = shalt.err (!%p4728_p2)
}
   0xa   :  { %s4732_s23 = scalar_lea.vmem %s18_s13, 896  ;;  %p4737_p4 = scmp.lt.s32.totalorder %s18_s13, %s18_s13 }
   0xb   :  { %p4733_p3 = scmp.ne.s32.totalorder %s18_s13, %s4732_s23  ;;  %p4738_p5 = scmp.lt.s32.totalorder %s4732_s23, %s4732_s23 }
   0xd   :  { %p4739_p6 = por %p4738_p5, %p4737_p4 }
   0xf   :  { %p4740_p7 = pnand %p4739_p6, %p4733_p3 }
  0x11   :  { %4743 = shalt.err (!%p4740_p7)
}
  0x12   :  { %20 = dma.hbm_to_vmem [thread:$0]  %s6481_s0, 896, %s18_s13, [#allocation3]  }
  0x13   :  { %s4744_s28 = scalar_lea.hbm %s6482_s1, 13184 }
  0x14   :  { %p4745_p8 = scmp.ne.s32.totalorder %s6482_s1, %s4744_s28  ;;  %p4748_p9 = scmp.lt.u32.totalorder %s4744_s28, %s6482_s1 }
  0x16   :  { %p4750_p10 = pnand %p4748_p9, %p4745_p8 }
  0x18   :  { %4753 = shalt.err (!%p4750_p10)
}
  0x19   :  { %s4754_s6 = scalar_lea.vmem %s4822_s15, 13184  ;;  %p4759_p12 = scmp.lt.s32.totalorder %s4822_s15, %s4822_s15 }
  0x1a   :  { %p4755_p11 = scmp.ne.s32.totalorder %s4822_s15, %s4754_s6  ;;  %p4760_p13 = scmp.lt.s32.totalorder %s4754_s6, %s4754_s6 }
  0x1c   :  { %p4761_p0 = por %p4760_p13, %p4759_p12 }
  0x1e   :  { %p4762_p1 = pnand %p4761_p0, %p4755_p11 }
  0x20   :  { %4765 = shalt.err (!%p4762_p1)
}
  0x21   :  { %s4796_s0 = smov 128   ;;  %s4797_s7 = smov 8  }
  0x22   :  { %32 = dma.hbm_to_vmem [thread:$0]  %s6482_s1, 13184, %s4822_s15, [#allocation6], %s4796_s0, %s4796_s0, %s4797_s7  }
  0x23   :  { %4788 = dma.done.wait [#allocation3], 896  }
  0x24   :  { %4789 = vsyncadd [#allocation3], 4294966400 }
  0x25   :  { %4790 = dma.done.wait [#allocation6], 13184  }
  0x26   :  { %4791 = vsyncadd [#allocation6], 4294954112  ;;  %v64_v0 = vld [vmem:[#allocation5 + $0x80] sm:$0xff]  ;;  %v65_v1 = vld [vmem:[#allocation5 + $0x88] sm:$0xff]  ;;  %vm162_vm0 = vcmask 1042432   ;;  %vm4799_vm1 = vmmov 0  }
  0x27   :  { %v48_v2 = vld [vmem:[#allocation5] sm:$0xff]  ;;  %v215_v3 = vand.u32 4294901760, %v64_v0  ;;  %v218_v4 = vand.u32 4294901760, %v65_v1  ;;  %v49_v5 = vld [vmem:[#allocation5 + $0x8] sm:$0xff]  ;;  %v66_v7 = vld [vmem:[#allocation5 + $0x90] sm:$0xff]  ;;  %vm158_vm2 = vcmask 416768  }
  0x28   :  { %v167_v6 = vand.u32 4294901760, %v48_v2  ;;  %v67_v8 = vld [vmem:[#allocation5 + $0x98] sm:$0xff]  ;;  %v170_v9 = vand.u32 4294901760, %v49_v5  ;;  %v221_v10 = vand.u32 4294901760, %v66_v7  ;;  %v50_v12 = vld [vmem:[#allocation5 + $0x10] sm:$0xff]  ;;  %v68_v18 = vld [vmem:[#allocation5 + $0xa0] sm:$0xff] }
  0x29   :  { %v224_v11 = vand.u32 4294901760, %v67_v8  ;;  %v4853_v13 = vpack.c.bf16 %v218_v4, %v215_v3  ;;  %v4855_v14 = vsub.f32 %v64_v0, %v215_v3  ;;  %v4857_v15 = vsub.f32 %v65_v1, %v218_v4  ;;  %v51_v17 = vld [vmem:[#allocation5 + $0x18] sm:$0xff]  ;;  %v69_v23 = vld [vmem:[#allocation5 + $0xa8] sm:$0xff]  ;;  %v52_v24 = vld [vmem:[#allocation5 + $0x20] sm:$0xff] }
  0x2a   :  { %v4859_v16 = vsub.f32 %v48_v2, %v167_v6  ;;  %v4861_v19 = vpack.c.bf16 %v170_v9, %v167_v6  ;;  %v4863_v20 = vsub.f32 %v49_v5, %v170_v9  ;;  %v4867_v22 = vsub.f32 %v66_v7, %v221_v10  ;;  %v53_v28 = vld [vmem:[#allocation5 + $0x28] sm:$0xff]  ;;  %v70_v33 = vld [vmem:[#allocation5 + $0xb0] sm:$0xff]  ;;  %v71_v38 = vld [vmem:[#allocation5 + $0xb8] sm:$0xff] }
  0x2b   :  { %v4865_v21 = vpack.c.bf16 %v224_v11, %v221_v10  ;;  %4075 = vmatprep.subr.bf16.mxu1 %v4853_v13  ;;  %v4138_v25 = vpack.c.bf16 %v4857_v15, %v4855_v14  ;;  %v4872_v26 = vsub.f32 %v67_v8, %v224_v11  ;;  %v173_v27 = vand.u32 4294901760, %v50_v12  ;;  %v54_v43 = vld [vmem:[#allocation5 + $0x30] sm:$0xff]  ;;  %v55_v44 = vld [vmem:[#allocation5 + $0x38] sm:$0xff]  ;;  %v72_v49 = vld [vmem:[#allocation5 + $0xc0] sm:$0xff] }
  0x2c   :  { %4077 = vmatpush3.bf16.msra.mxu1 %v4861_v19  ;;  %v4140_v30 = vpack.c.bf16 %v4863_v20, %v4859_v16  ;;  %v176_v31 = vand.u32 4294901760, %v51_v17  ;;  %v227_v32 = vand.u32 4294901760, %v68_v18  ;;  %v230_v36 = vand.u32 4294901760, %v69_v23  ;;  %v73_v54 = vld [vmem:[#allocation5 + $0xc8] sm:$0xff]  ;;  %v56_v59 = vld [vmem:[#allocation5 + $0x40] sm:$0xff]  ;;  %v74_v1 = vld [vmem:[#allocation5 + $0xd0] sm:$0xff] }
  0x2d   :  { %4139 = vmatprep.subr.bf16.mxu0 %v4138_v25  ;;  %4079 = vmatprep.subr.bf16.mxu1 %v4865_v21  ;;  %v4879_v34 = vsub.f32 %v50_v12, %v173_v27  ;;  %v4142_v35 = vpack.c.bf16 %v4872_v26, %v4867_v22  ;;  %v179_v37 = vand.u32 4294901760, %v52_v24  ;;  %v182_v42 = vand.u32 4294901760, %v53_v28  ;;  %v57_v60 = vld [vmem:[#allocation5 + $0x48] sm:$0xff]  ;;  %v75_v6 = vld [vmem:[#allocation5 + $0xd8] sm:$0xff]  ;;  %v58_v11 = vld [vmem:[#allocation5 + $0x50] sm:$0xff] }
  0x2e   :  { %4141 = vmatpush3.bf16.msra.mxu0 %v4140_v30  ;;  %v4883_v39 = vpack.c.bf16 %v176_v31, %v173_v27  ;;  %v4885_v40 = vsub.f32 %v51_v17, %v176_v31  ;;  %v4887_v41 = vsub.f32 %v68_v18, %v227_v32  ;;  %v4889_v45 = vpack.c.bf16 %v230_v36, %v227_v32  ;;  %v59_v12 = vld [vmem:[#allocation5 + $0x58] sm:$0xff]  ;;  %v76_v25 = vld [vmem:[#allocation5 + $0xe0] sm:$0xff]  ;;  %v77_v32 = vld [vmem:[#allocation5 + $0xe8] sm:$0xff] }
  0x2f   :  { %4143 = vmatprep.subr.bf16.mxu0 %v4142_v35  ;;  %v4891_v46 = vsub.f32 %v69_v23, %v230_v36  ;;  %v4893_v47 = vsub.f32 %v52_v24, %v179_v37  ;;  %v233_v48 = vand.u32 4294901760, %v70_v33  ;;  %v4898_v51 = vpack.c.bf16 %v182_v42, %v179_v37 }
  0x30   :  { %4081 = vmatpush3.bf16.msra.mxu1 %v4883_v39  ;;  %v4144_v50 = vpack.c.bf16 %v4885_v40, %v4879_v34  ;;  %v4900_v52 = vsub.f32 %v53_v28, %v182_v42  ;;  %v236_v53 = vand.u32 4294901760, %v71_v38  ;;  %v185_v57 = vand.u32 4294901760, %v54_v43  ;;  %v61_v42 = vld [vmem:[#allocation5 + $0x68] sm:$0xff] }
  0x31   :  { %4083 = vmatprep.subr.bf16.mxu1 %v4889_v45  ;;  %v4146_v55 = vpack.c.bf16 %v4891_v46, %v4887_v41  ;;  %v4905_v56 = vsub.f32 %v70_v33, %v233_v48  ;;  %v188_v58 = vand.u32 4294901760, %v55_v44  ;;  %v239_v0 = vand.u32 4294901760, %v72_v49 }
  0x32   :  { %4145 = vmatpush3.bf16.msra.mxu0 %v4144_v50  ;;  %v4148_v61 = vpack.c.bf16 %v4900_v52, %v4893_v47  ;;  %v4909_v62 = vpack.c.bf16 %v236_v53, %v233_v48  ;;  %v4911_v63 = vsub.f32 %v71_v38, %v236_v53  ;;  %v4915_v3 = vsub.f32 %v54_v43, %v185_v57  ;;  %v60_v38 = vld [vmem:[#allocation5 + $0x60] sm:$0xff]  ;;  %v78_v50 = vld [vmem:[#allocation5 + $0xf0] sm:$0xff] }
  0x33   :  { %4147 = vmatprep.subr.bf16.mxu0 %v4146_v55  ;;  %v4913_v2 = vpack.c.bf16 %v188_v58, %v185_v57  ;;  %v4917_v4 = vsub.f32 %v55_v44, %v188_v58  ;;  %v242_v5 = vand.u32 4294901760, %v73_v54  ;;  %v4922_v8 = vsub.f32 %v72_v49, %v239_v0  ;;  %v79_v58 = vld [vmem:[#allocation5 + $0xf8] sm:$0xff] }
  0x34   :  { %6623 = vst [vmem:[#allocation11_spill] sm:$0xff] %v4909_v62  ;;  %4085 = vmatpush3.bf16.msra.mxu1 %v4898_v51  ;;  %v4150_v7 = vpack.c.bf16 %v4911_v63, %v4905_v56  ;;  %v191_v9 = vand.u32 4294901760, %v56_v59  ;;  %v194_v10 = vand.u32 4294901760, %v57_v60  ;;  %v245_v24 = vand.u32 4294901760, %v74_v1 }
  0x35   :  { %6624 = vst [vmem:[#allocation12_spill] sm:$0xff] %v4913_v2  ;;  %4087 = vmatprep.subr.bf16.mxu1 %v4909_v62  ;;  %v4926_v18 = vpack.c.bf16 %v242_v5, %v239_v0  ;;  %v4928_v23 = vsub.f32 %v73_v54, %v242_v5  ;;  %v4152_v27 = vpack.c.bf16 %v4917_v4, %v4915_v3  ;;  %v248_v31 = vand.u32 4294901760, %v75_v6  ;;  %v63_v5 = vld [vmem:[#allocation5 + $0x78] sm:$0xff] }
  0x36   :  { %4149 = vmatpush3.bf16.msra.mxu0 %v4148_v61  ;;  %v4932_v28 = vsub.f32 %v56_v59, %v191_v9  ;;  %v4934_v30 = vsub.f32 %v57_v60, %v194_v10  ;;  %v4938_v35 = vsub.f32 %v74_v1, %v245_v24  ;;  %v197_v36 = vand.u32 4294901760, %v58_v11  ;;  %v62_v1 = vld [vmem:[#allocation5 + $0x70] sm:$0xff] }
  0x37   :  { %6625 = vst [vmem:[#allocation13_spill] sm:$0xff] %v4926_v18  ;;  %4151 = vmatprep.subr.bf16.mxu0 %v4150_v7  ;;  %v4154_v33 = vpack.c.bf16 %v4928_v23, %v4922_v8  ;;  %v200_v37 = vand.u32 4294901760, %v59_v12  ;;  %v4941_v43 = vpack.c.bf16 %v194_v10, %v191_v9  ;;  %v4945_v48 = vsub.f32 %v75_v6, %v248_v31 }
  0x38   :  { %4089 = vmatpush3.bf16.msra.mxu1 %v4913_v2  ;;  %v4156_v44 = vpack.c.bf16 %v4934_v30, %v4932_v28  ;;  %v251_v49 = vand.u32 4294901760, %v76_v25  ;;  %v4948_v53 = vpack.c.bf16 %v248_v31, %v245_v24  ;;  %v4950_v54 = vsub.f32 %v58_v11, %v197_v36  ;;  %v42_v11 = vld [vmem:[#allocation2 + $0x8] sm:$0xff]  ;;  %v41_v31 = vld [vmem:[#allocation2] sm:$0xff] }
  0x39   :  { %6626 = vst [vmem:[#allocation14_spill] sm:$0xff] %v4941_v43  ;;  %4091 = vmatprep.subr.bf16.mxu1 %v4926_v18  ;;  %v4952_v55 = vsub.f32 %v59_v12, %v200_v37  ;;  %v254_v57 = vand.u32 4294901760, %v77_v32  ;;  %v4954_v59 = vpack.c.bf16 %v200_v37, %v197_v36  ;;  %v203_v61 = vand.u32 4294901760, %v60_v38 }
  0x3a   :  { %6627 = vst [vmem:[#allocation15_spill] sm:$0xff] %v4948_v53  ;;  %4153 = vmatpush3.bf16.msra.mxu0 %v4152_v27  ;;  %v4956_v60 = vsub.f32 %v76_v25, %v251_v49  ;;  %v206_v0 = vand.u32 4294901760, %v61_v42  ;;  %v4158_v6 = vpack.c.bf16 %v4945_v48, %v4938_v35  ;;  %v257_v10 = vand.u32 4294901760, %v78_v50 }
  0x3b   :  { %6628 = vst [vmem:[#allocation16_spill] sm:$0xff] %v4954_v59  ;;  %4155 = vmatprep.subr.bf16.mxu0 %v4154_v33  ;;  %v4160_v7 = vpack.c.bf16 %v4952_v55, %v4950_v54  ;;  %v4962_v9 = vsub.f32 %v77_v32, %v254_v57  ;;  %v4965_v12 = vpack.c.bf16 %v254_v57, %v251_v49  ;;  %v260_v27 = vand.u32 4294901760, %v79_v58 }
  0x3c   :  { %4093 = vmatpush3.bf16.msra.mxu1 %v4941_v43  ;;  %v4967_v24 = vsub.f32 %v60_v38, %v203_v61  ;;  %v4969_v25 = vsub.f32 %v61_v42, %v206_v0  ;;  %v4972_v33 = vpack.c.bf16 %v206_v0, %v203_v61  ;;  %v4974_v36 = vsub.f32 %v78_v50, %v257_v10 }
  0x3d   :  { %6629 = vst [vmem:[#allocation17_spill] sm:$0xff] %v4965_v12  ;;  %4095 = vmatprep.subr.bf16.mxu1 %v4948_v53  ;;  %v209_v32 = vand.u32 4294901760, %v62_v1  ;;  %v212_v37 = vand.u32 4294901760, %v63_v5  ;;  %v4162_v17 = vpack.c.bf16 %v4962_v9, %v4956_v60  ;;  %v4980_v49 = vsub.f32 %v79_v58, %v260_v27 }
  0x3e   :  { %6630 = vst [vmem:[#allocation18_spill] sm:$0xff] %v4972_v33  ;;  %4157 = vmatpush3.bf16.msra.mxu0 %v4156_v44  ;;  %v4164_v38 = vpack.c.bf16 %v4969_v25, %v4967_v24  ;;  %v4982_v42 = vand.u32 4294901760, %v42_v11  ;;  %v4984_v57 = vpack.c.bf16 %v260_v27, %v257_v10  ;;  %v4990_v0 = vand.u32 4294901760, %v41_v31 }
  0x3f   :  { %4159 = vmatprep.subr.bf16.mxu0 %v4158_v6  ;;  %v4986_v61 = vsub.f32 %v62_v1, %v209_v32  ;;  %v4988_v50 = vsub.f32 %v63_v5, %v212_v37  ;;  %v4993_v44 = vpack.c.bf16 %v212_v37, %v209_v32  ;;  %v393_v58 = vand.u32 4294901760, %v4855_v14 }
  0x40   :  { %6631 = vst [vmem:[#allocation19_spill] sm:$0xff] %v4984_v57  ;;  %4097 = vmatpush3.bf16.msra.mxu1 %v4954_v59  ;;  %v4996_v29 = vsub.f32 %v42_v11, %v4982_v42  ;;  %v400_v53 = vand.u32 4294901760, %v4857_v15  ;;  %v4166_v1 = vpack.c.bf16 %v4980_v49, %v4974_v36  ;;  %v5004_v5 = vsub.f32 %v41_v31, %v4990_v0 }
  0x41   :  { %4099 = vmatprep.subr.bf16.mxu1 %v4965_v12  ;;  %v6632_v6 = vand.u32 4294901760, %v4859_v16  ;;  %v6633_v27 = vand.u32 4294901760, %v4863_v20  ;;  %v4168_v37 = vpack.c.bf16 %v4988_v50, %v4986_v61  ;;  %v394_v12 = vsub.f32 %v4855_v14, %v393_v58 }
  0x42   :  { %4161 = vmatpush3.bf16.msra.mxu0 %v4160_v7  ;;  %v6497_v32 = vand.u32 4294901760, %v4996_v29  ;;  %v401_v59 = vsub.f32 %v4857_v15, %v400_v53  ;;  %640 = vmatprep.mubr.f32.mxu0 %v4996_v29  ;;  %v6504_v31 = vand.u32 4294901760, %v5004_v5  ;;  %v4202_v18 = vpack.c.bf16 %v400_v53, %v393_v58 }
  0x43   :  { %v282_v10 = vsub.f32 %v4859_v16, %v6632_v6  ;;  %v289_v11 = vsub.f32 %v4863_v20, %v6633_v27  ;;  %4163 = vmatprep.subr.bf16.mxu0 %v4162_v17  ;;  %v395_v27 = vand.u32 4294901760, %v394_v12  ;;  %v407_v14 = vand.u32 4294901760, %v4867_v22 }
  0x44   :  { %4101 = vmatpush3.bf16.msra.mxu1 %v4972_v33  ;;  %v265_v7 = vsub.f32 %v4996_v29, %v6497_v32  ;;  %v402_v2 = vand.u32 4294901760, %v401_v59  ;;  %v271_v15 = vsub.f32 %v5004_v5, %v6504_v31  ;;  %v6634_v17 = vand.u32 4294901760, %v4859_v16 }
  0x45   :  { %v283_v6 = vand.u32 4294901760, %v282_v10  ;;  %v290_v43 = vand.u32 4294901760, %v289_v11  ;;  %4103 = vmatprep.subr.bf16.mxu1 %v4984_v57  ;;  %v6635_v53 = vand.u32 4294901760, %v4863_v20  ;;  %v414_v10 = vand.u32 4294901760, %v4872_v26 }
  0x46   :  { %v295_v11 = vand.u32 4294901760, %v4879_v34  ;;  %4165 = vmatpush3.bf16.msra.mxu0 %v4164_v38  ;;  %v266_v12 = vand.u32 4294901760, %v265_v7  ;;  %v4106_v59 = vpack.c.bf16 %v402_v2, %v395_v27  ;;  %v408_v32 = vsub.f32 %v4867_v22, %v407_v14 }
  0x47   :  { %v4204_v58 = vpack.c.bf16 %v6635_v53, %v6634_v17  ;;  %v302_v57 = vand.u32 4294901760, %v4885_v40  ;;  %4167 = vmatprep.subr.bf16.mxu0 %v4166_v1  ;;  %v272_v33 = vand.u32 4294901760, %v271_v15  ;;  %v4108_v62 = vpack.c.bf16 %v290_v43, %v283_v6 }
  0x48   :  { %v415_v31 = vsub.f32 %v4872_v26, %v414_v10  ;;  %v296_v16 = vsub.f32 %v4879_v34, %v295_v11  ;;  %4105 = vmatpush3.bf16.msra.mxu1 %v4993_v44  ;;  %267 = vmatprep.mubr.f32.mxu1 %v266_v12  ;;  %v409_v20 = vand.u32 4294901760, %v408_v32  ;;  %v4206_v38 = vpack.c.bf16 %v414_v10, %v407_v14 }
  0x49   :  { %v303_v17 = vsub.f32 %v4885_v40, %v302_v57  ;;  %v421_v2 = vand.u32 4294901760, %v4887_v41  ;;  %4107 = vmatprep.subr.bf16.mxu1 %v4106_v59  ;;  %v428_v1 = vand.u32 4294901760, %v4891_v46  ;;  %v309_v43 = vand.u32 4294901760, %v4893_v47 }
  0x4a   :  { %v416_v22 = vand.u32 4294901760, %v415_v31  ;;  %v297_v7 = vand.u32 4294901760, %v296_v16  ;;  %4169 = vmatpush3.bf16.msra.mxu0 %v4168_v37  ;;  %v316_v6 = vand.u32 4294901760, %v4900_v52  ;;  %v435_v32 = vand.u32 4294901760, %v4905_v56 }
  0x4b   :  { %v304_v26 = vand.u32 4294901760, %v303_v17  ;;  %v422_v34 = vsub.f32 %v4887_v41, %v421_v2  ;;  %273 = vmatmul.mubr.f32.vlgmr.msra.gmra.mrb[0].mxu1 %v272_v33  ;;  %4203 = vmatprep.subr.bf16.mxu0 %v4202_v18  ;;  %v429_v27 = vsub.f32 %v4891_v46, %v428_v1  ;;  %v310_v31 = vsub.f32 %v4893_v47, %v309_v43 }
  0x4c   :  { %v4110_v40 = vpack.c.bf16 %v416_v22, %v409_v20  ;;  %v442_v14 = vand.u32 4294901760, %v4911_v63  ;;  %4109 = vmatpush3.bf16.msra.mxu1 %v4108_v62  ;;  %v317_v37 = vsub.f32 %v4900_v52, %v316_v6  ;;  %503 = vmatprep.mubr.f32.mxu1 %v4982_v42  ;;  %v4208_v41 = vpack.c.bf16 %v302_v57, %v295_v11 }
  0x4d   :  { %v4112_v15 = vpack.c.bf16 %v304_v26, %v297_v7  ;;  %v423_v53 = vand.u32 4294901760, %v422_v34  ;;  %643 = vmatmul.mubr.f32.vlgmr.msra.gmra.mrb[0].mxu0 %v5004_v5  ;;  %v430_v33 = vand.u32 4294901760, %v429_v27  ;;  %v311_v18 = vand.u32 4294901760, %v310_v31 }
  0x4e   :  { %4111 = vmatprep.subr.bf16.mxu1 %v4110_v40  ;;  %v436_v10 = vsub.f32 %v4905_v56, %v435_v32  ;;  %4205 = vmatpush3.bf16.msra.mxu0 %v4204_v58  ;;  %v318_v46 = vand.u32 4294901760, %v317_v37  ;;  %v443_v47 = vsub.f32 %v4911_v63, %v442_v14  ;;  %v323_v62 = vand.u32 4294901760, %v4915_v3 }
  0x4f   :  { %v330_v12 = vand.u32 4294901760, %v4917_v4  ;;  %917 = vmatprep.mubr.f32.mxu0 %v4982_v42  ;;  %4207 = vmatprep.subr.bf16.mxu0 %v4206_v38  ;;  %v4114_v52 = vpack.c.bf16 %v430_v33, %v423_v53  ;;  %v4210_v59 = vpack.c.bf16 %v428_v1, %v421_v2  ;;  %v449_v57 = vand.u32 4294901760, %v4922_v8 }
  0x50   :  { %v437_v16 = vand.u32 4294901760, %v436_v10  ;;  %4113 = vmatpush3.bf16.msra.mxu1 %v4112_v15  ;;  %v4116_v11 = vpack.c.bf16 %v318_v46, %v311_v18  ;;  %v444_v20 = vand.u32 4294901760, %v443_v47  ;;  %v324_v56 = vsub.f32 %v4915_v3, %v323_v62 }
  0x51   :  { %v331_v58 = vsub.f32 %v4917_v4, %v330_v12  ;;  %4115 = vmatprep.subr.bf16.mxu1 %v4114_v52  ;;  %v4212_v63 = vpack.c.bf16 %v316_v6, %v309_v43  ;;  %v450_v17 = vsub.f32 %v4922_v8, %v449_v57  ;;  %v456_v22 = vand.u32 4294901760, %v4928_v23 }
  0x52   :  { %v337_v38 = vand.u32 4294901760, %v4932_v28  ;;  %4209 = vmatpush3.bf16.msra.mxu0 %v4208_v41  ;;  %v4118_v2 = vpack.c.bf16 %v444_v20, %v437_v16  ;;  %v325_v7 = vand.u32 4294901760, %v324_v56  ;;  %v344_v26 = vand.u32 4294901760, %v4934_v30 }
  0x53   :  { %v332_v1 = vand.u32 4294901760, %v331_v58  ;;  %4211 = vmatprep.subr.bf16.mxu0 %v4210_v59  ;;  %v4214_v34 = vpack.c.bf16 %v442_v14, %v435_v32  ;;  %v451_v40 = vand.u32 4294901760, %v450_v17  ;;  %v457_v3 = vsub.f32 %v4928_v23, %v456_v22 }
  0x54   :  { %v338_v4 = vsub.f32 %v4932_v28, %v337_v38  ;;  %4117 = vmatpush3.bf16.msra.mxu1 %v4116_v11  ;;  %v4216_v8 = vpack.c.bf16 %v330_v12, %v323_v62  ;;  %v345_v6 = vsub.f32 %v4934_v30, %v344_v26  ;;  %v463_v27 = vand.u32 4294901760, %v4938_v35 }
  0x55   :  { %v4120_v43 = vpack.c.bf16 %v332_v1, %v325_v7  ;;  %4119 = vmatprep.subr.bf16.mxu1 %v4118_v2  ;;  %v458_v31 = vand.u32 4294901760, %v457_v3  ;;  %v470_v53 = vand.u32 4294901760, %v4945_v48  ;;  %v351_v37 = vand.u32 4294901760, %v4950_v54 }
  0x56   :  { %v339_v15 = vand.u32 4294901760, %v338_v4  ;;  %4213 = vmatpush3.bf16.msra.mxu0 %v4212_v63  ;;  %v346_v32 = vand.u32 4294901760, %v345_v6  ;;  %v464_v23 = vsub.f32 %v4938_v35, %v463_v27  ;;  %v358_v28 = vand.u32 4294901760, %v4952_v55 }
  0x57   :  { %v477_v14 = vand.u32 4294901760, %v4956_v60  ;;  %4215 = vmatprep.subr.bf16.mxu0 %v4214_v34  ;;  %v4122_v41 = vpack.c.bf16 %v458_v31, %v451_v40  ;;  %v4218_v30 = vpack.c.bf16 %v456_v22, %v449_v57  ;;  %v471_v33 = vsub.f32 %v4945_v48, %v470_v53 }
  0x58   :  { %v352_v18 = vsub.f32 %v4950_v54, %v351_v37  ;;  %4121 = vmatpush3.bf16.msra.mxu1 %v4120_v43  ;;  %v4124_v10 = vpack.c.bf16 %v346_v32, %v339_v15  ;;  %v4220_v46 = vpack.c.bf16 %v344_v26, %v337_v38  ;;  %v465_v47 = vand.u32 4294901760, %v464_v23  ;;  %v5091_v43 = vld [vmem:[#allocation5 + $0x180] sm:$0xff] }
  0x59   :  { %v359_v62 = vsub.f32 %v4952_v55, %v358_v28  ;;  %4123 = vmatprep.subr.bf16.mxu1 %v4122_v41  ;;  %v472_v12 = vand.u32 4294901760, %v471_v33  ;;  %v478_v52 = vsub.f32 %v4956_v60, %v477_v14  ;;  %v484_v59 = vand.u32 4294901760, %v4962_v9  ;;  %v5097_v32 = vld [vmem:[#allocation5 + $0x100] sm:$0xff] }
  0x5a   :  { %v353_v35 = vand.u32 4294901760, %v352_v18  ;;  %4217 = vmatpush3.bf16.msra.mxu0 %v4216_v8  ;;  %v365_v57 = vand.u32 4294901760, %v4967_v24  ;;  %v372_v48 = vand.u32 4294901760, %v4969_v25  ;;  %v491_v54 = vand.u32 4294901760, %v4974_v36  ;;  %v5093_v8 = vld [vmem:[#allocation5 + $0x188] sm:$0xff] }
  0x5b   :  { %v360_v16 = vand.u32 4294901760, %v359_v62  ;;  %4219 = vmatprep.subr.bf16.mxu0 %v4218_v30  ;;  %v4126_v11 = vpack.c.bf16 %v472_v12, %v465_v47  ;;  %v4222_v20 = vpack.c.bf16 %v470_v53, %v463_v27  ;;  %v479_v56 = vand.u32 4294901760, %v478_v52  ;;  %v5115_v47 = vld [vmem:[#allocation5 + $0x110] sm:$0xff]  ;;  %v5117_v62 = vld [vmem:[#allocation5 + $0x118] sm:$0xff]  ;;  %v5119_v12 = vld [vmem:[#allocation5 + $0x1a0] sm:$0xff] }
  0x5c   :  { %v485_v55 = vsub.f32 %v4962_v9, %v484_v59  ;;  %4125 = vmatpush3.bf16.msra.mxu1 %v4124_v10  ;;  %v4224_v63 = vpack.c.bf16 %v358_v28, %v351_v37  ;;  %v366_v60 = vsub.f32 %v4967_v24, %v365_v57  ;;  %v373_v17 = vsub.f32 %v4969_v25, %v372_v48  ;;  %v5101_v28 = vld [vmem:[#allocation5 + $0x190] sm:$0xff] }
  0x5d   :  { %v4128_v58 = vpack.c.bf16 %v360_v16, %v353_v35  ;;  %4127 = vmatprep.subr.bf16.mxu1 %v4126_v11  ;;  %v492_v38 = vsub.f32 %v4974_v36, %v491_v54  ;;  %v498_v2 = vand.u32 4294901760, %v4980_v49  ;;  %v379_v7 = vand.u32 4294901760, %v4986_v61  ;;  %v5121_v35 = vld [vmem:[#allocation5 + $0x1a8] sm:$0xff]  ;;  %v5142_v11 = vld [vmem:[#allocation5 + $0x120] sm:$0xff] }
  0x5e   :  { %v486_v22 = vand.u32 4294901760, %v485_v55  ;;  %4221 = vmatpush3.bf16.msra.mxu0 %v4220_v46  ;;  %v367_v1 = vand.u32 4294901760, %v366_v60  ;;  %v374_v26 = vand.u32 4294901760, %v373_v17  ;;  %v4226_v34 = vpack.c.bf16 %v484_v59, %v477_v14  ;;  %v5103_v14 = vld [vmem:[#allocation5 + $0x198] sm:$0xff] }
  0x5f   :  { %v386_v9 = vand.u32 4294901760, %v4988_v50  ;;  %4223 = vmatprep.subr.bf16.mxu0 %v4222_v20  ;;  %v493_v3 = vand.u32 4294901760, %v492_v38  ;;  %v499_v24 = vsub.f32 %v4980_v49, %v498_v2  ;;  %v380_v25 = vsub.f32 %v4986_v61, %v379_v7  ;;  %v5144_v20 = vld [vmem:[#allocation5 + $0x128] sm:$0xff]  ;;  %v5149_v55 = vld [vmem:[#allocation5 + $0x1b8] sm:$0xff] }
  0x60   :  { %v4130_v40 = vpack.c.bf16 %v486_v22, %v479_v56  ;;  %4129 = vmatpush3.bf16.msra.mxu1 %v4128_v58  ;;  %v4132_v4 = vpack.c.bf16 %v374_v26, %v367_v1  ;;  %v4228_v31 = vpack.c.bf16 %v372_v48, %v365_v57  ;;  %v4230_v37 = vpack.c.bf16 %v498_v2, %v491_v54  ;;  %v5147_v56 = vld [vmem:[#allocation5 + $0x1b0] sm:$0xff]  ;;  %v5178_v1 = vld [vmem:[#allocation5 + $0x1c0] sm:$0xff]  ;;  %v5180_v26 = vld [vmem:[#allocation5 + $0x1c8] sm:$0xff] }
  0x61   :  { %v387_v36 = vsub.f32 %v4988_v50, %v386_v9  ;;  %v500_v6 = vand.u32 4294901760, %v499_v24  ;;  %v381_v27 = vand.u32 4294901760, %v380_v25  ;;  %v6522_v49 = vand.u32 4294901760, %v5091_v43  ;;  %v5099_v50 = vld [vmem:[#allocation5 + $0x108] sm:$0xff]  ;;  %v5173_v2 = vld [vmem:[#allocation5 + $0x130] sm:$0xff] }
  0x62   :  { %4131 = vmatprep.subr.bf16.mxu1 %v4130_v40  ;;  %4225 = vmatpush3.bf16.msra.mxu0 %v4224_v63  ;;  %v6521_v61 = vand.u32 4294901760, %v5093_v8  ;;  %v4232_v41 = vpack.c.bf16 %v386_v9, %v379_v7  ;;  %v6520_v30 = vand.u32 4294901760, %v5097_v32  ;;  %v6519_v33 = vand.u32 4294901760, %v5099_v50  ;;  %v5175_v7 = vld [vmem:[#allocation5 + $0x138] sm:$0xff] }
  0x63   :  { %v388_v15 = vand.u32 4294901760, %v387_v36  ;;  %4227 = vmatprep.subr.bf16.mxu0 %v4226_v34  ;;  %v4134_v53 = vpack.c.bf16 %v500_v6, %v493_v3  ;;  %v6518_v10 = vand.u32 4294901760, %v5101_v28  ;;  %v6517_v46 = vand.u32 4294901760, %v5103_v14  ;;  %v44_v3 = vld [vmem:[#allocation2 + $0x18] sm:$0xff]  ;;  %v5203_v6 = vld [vmem:[#allocation5 + $0x148] sm:$0xff] }
  0x64   :  { %4133 = vmatpush3.bf16.msra.mxu1 %v4132_v4  ;;  %v5111_v18 = vpack.c.bf16 %v6521_v61, %v6522_v49  ;;  %v5128_v52 = vpack.c.bf16 %v6519_v33, %v6520_v30  ;;  %v6514_v59 = vand.u32 4294901760, %v5115_v47  ;;  %v6513_v16 = vand.u32 4294901760, %v5117_v62  ;;  %v5201_v36 = vld [vmem:[#allocation5 + $0x140] sm:$0xff] }
  0x65   :  { %v4136_v23 = vpack.c.bf16 %v388_v15, %v381_v27  ;;  %4135 = vmatprep.subr.bf16.mxu1 %v4134_v53  ;;  %v5138_v57 = vpack.c.bf16 %v6517_v46, %v6518_v10  ;;  %v6512_v48 = vand.u32 4294901760, %v5119_v12  ;;  %v6511_v54 = vand.u32 4294901760, %v5121_v35  ;;  %v5206_v27 = vld [vmem:[#allocation5 + $0x1d0] sm:$0xff]  ;;  %v6644_v15 = vld [vmem:[#allocation11_spill] sm:$0xff]  ;;  %v6653_v10 = vld [vmem:[#allocation14_spill] sm:$0xff] }
  0x66   :  { %4229 = vmatpush3.bf16.msra.mxu0 %v4228_v31  ;;  %6636 = vst [vmem:[#allocation20_spill] sm:$0xff] %v5111_v18  ;;  %6637 = vst [vmem:[#allocation21_spill] sm:$0xff] %v5128_v52  ;;  %v6639_v58 = vand.u32 4294901760, %v4996_v29  ;;  %v5160_v63 = vpack.c.bf16 %v6513_v16, %v6514_v59  ;;  %v6508_v60 = vand.u32 4294901760, %v5142_v11  ;;  %v6507_v17 = vand.u32 4294901760, %v5144_v20  ;;  %v5208_v31 = vld [vmem:[#allocation5 + $0x1d8] sm:$0xff] }
  0x67   :  { %4231 = vmatprep.subr.bf16.mxu0 %v4230_v37  ;;  %6638 = vst [vmem:[#allocation22_spill] sm:$0xff] %v5138_v57  ;;  %v5169_v29 = vpack.c.bf16 %v6511_v54, %v6512_v48  ;;  %v6506_v22 = vand.u32 4294901760, %v5147_v56  ;;  %v6505_v38 = vand.u32 4294901760, %v5149_v55  ;;  %v6510_v9 = vand.u32 4294901760, %v5173_v2  ;;  %v6648_v54 = vld [vmem:[#allocation12_spill] sm:$0xff]  ;;  %v5239_v48 = vld [vmem:[#allocation5 + $0x1e0] sm:$0xff] }
  0x68   :  { %4137 = vmatpush3.bf16.msra.mxu1 %v4136_v23  ;;  %6640 = vst [vmem:[#allocation23_spill] sm:$0xff] %v5160_v63  ;;  %v5188_v34 = vpack.c.bf16 %v6507_v17, %v6508_v60  ;;  %v6509_v40 = vand.u32 4294901760, %v5175_v7  ;;  %v6516_v25 = vand.u32 4294901760, %v5178_v1  ;;  %v6515_v4 = vand.u32 4294901760, %v5180_v26  ;;  %v5231_v60 = vld [vmem:[#allocation5 + $0x150] sm:$0xff]  ;;  %v5241_v16 = vld [vmem:[#allocation5 + $0x1e8] sm:$0xff] }
  0x69   :  { %4171 = vmatprep.subr.bf16.mxu1 %v4853_v13  ;;  %6641 = vst [vmem:[#allocation24_spill] sm:$0xff] %v5169_v29  ;;  %v5197_v24 = vpack.c.bf16 %v6505_v38, %v6506_v22  ;;  %v5211_v53 = vand.u32 4294901760, %v44_v3  ;;  %v6524_v23 = vand.u32 4294901760, %v5201_v36  ;;  %v6528_v22 = vand.u32 4294901760, %v5206_v27  ;;  %v6649_v59 = vld [vmem:[#allocation13_spill] sm:$0xff]  ;;  %v5265_v49 = vld [vmem:[#allocation5 + $0x160] sm:$0xff] }
  0x6a   :  { %4233 = vmatpush3.bf16.msra.mxu0 %v4232_v41  ;;  %6642 = vst [vmem:[#allocation25_spill] sm:$0xff] %v5188_v34  ;;  %v5218_v37 = vpack.c.bf16 %v6509_v40, %v6510_v9  ;;  %v6523_v41 = vand.u32 4294901760, %v5203_v6  ;;  %v5227_v38 = vpack.c.bf16 %v6515_v4, %v6516_v25  ;;  %v6527_v17 = vand.u32 4294901760, %v5208_v31  ;;  %v5233_v40 = vld [vmem:[#allocation5 + $0x158] sm:$0xff]  ;;  %v5273_v46 = vld [vmem:[#allocation5 + $0x1f0] sm:$0xff] }
  0x6b   :  { %505 = vmatmul.mubr.f32.vlgmr.msra.gmra.mrb[2].mxu1 %v4990_v0  ;;  %4267 = vmatprep.subr.bf16.mxu0 %v5111_v18  ;;  %6643 = vst [vmem:[#allocation26_spill] sm:$0xff] %v5197_v24  ;;  %6645 = vst [vmem:[#allocation11_spill] sm:$0xff] %v5211_v53  ;;  %v5236_v9 = vsub.f32 %v44_v3, %v5211_v53  ;;  %v6656_v61 = vand.u32 4294901760, %v5231_v60  ;;  %v6673_v18 = vand.u32 4294901760, %v5097_v32 }
  0x6c   :  { %4173 = vmatpush3.bf16.msra.mxu1 %v4861_v19  ;;  %747 = vmatprep.mubr.f32.mxu1 %v6639_v58  ;;  %6646 = vst [vmem:[#allocation27_spill] sm:$0xff] %v5218_v37  ;;  %v43_v58 = vld [vmem:[#allocation2 + $0x10] sm:$0xff]  ;;  %6647 = vst [vmem:[#allocation28_spill] sm:$0xff] %v5227_v38  ;;  %v5252_v3 = vpack.c.bf16 %v6523_v41, %v6524_v23  ;;  %v5261_v33 = vpack.c.bf16 %v6527_v17, %v6528_v22  ;;  %v5267_v41 = vld [vmem:[#allocation5 + $0x168] sm:$0xff] }
  0x6d   :  { %919 = vmatmul.mubr.f32.vlgmr.msra.gmra.mrb[2].mxu0 %v4990_v0  ;;  %4175 = vmatprep.subr.bf16.mxu1 %v4865_v21  ;;  %v6533_v4 = vand.u32 4294901760, %v5236_v9  ;;  %v5245_v25 = vand.u32 4294901760, %v43_v58  ;;  %v6654_v17 = vld [vmem:[#allocation15_spill] sm:$0xff] }
  0x6e   :  { %4269 = vmatpush3.bf16.msra.mxu0 %v5128_v52  ;;  %6651 = vst [vmem:[#allocation13_spill] sm:$0xff] %v5252_v3  ;;  %6652 = vst [vmem:[#allocation29_spill] sm:$0xff] %v5261_v33 }
  0x6f   :  { %4271 = vmatprep.subr.bf16.mxu0 %v5138_v57  ;;  %6650 = vst [vmem:[#allocation12_spill] sm:$0xff] %v5245_v25  ;;  %v1127_v23 = vsub.f32 %v5236_v9, %v6533_v4  ;;  %v5279_v30 = vsub.f32 %v43_v58, %v5245_v25  ;;  %v5299_v57 = vld [vmem:[#allocation5 + $0x170] sm:$0xff]  ;;  %v6667_v25 = vand.u32 4294901760, %v5093_v8 }
  0x70   :  { %4177 = vmatpush3.bf16.msra.mxu1 %v4883_v39 }
  0x71   :  { %4179 = vmatprep.subr.bf16.mxu1 %v4889_v45  ;;  %v1128_v22 = vand.u32 4294901760, %v1127_v23  ;;  %6655 = vst [vmem:[#allocation14_spill] sm:$0xff] %v5279_v30  ;;  %v6660_v23 = vand.u32 4294901760, %v5241_v16  ;;  %v5323_v4 = vsub.f32 %v5093_v8, %v6667_v25  ;;  %v5340_v8 = vsub.f32 %v5097_v32, %v6673_v18 }
  0x72   :  { %4273 = vmatpush3.bf16.msra.mxu0 %v5160_v63  ;;  %v6670_v63 = vld [vmem:[#allocation18_spill] sm:$0xff]  ;;  %v6674_v25 = vand.u32 4294901760, %v5099_v50  ;;  %v6678_v32 = vand.u32 4294901760, %v5103_v14 }
  0x73   :  { %4275 = vmatprep.subr.bf16.mxu0 %v5169_v29  ;;  %v6659_v29 = vand.u32 4294901760, %v5239_v48  ;;  %1129 = vmatprep.mubr.f32.mxu0 %v1128_v22  ;;  %v6666_v22 = vand.u32 4294901760, %v5091_v43 }
  0x74   :  { %4181 = vmatpush3.bf16.msra.mxu1 %v4898_v51  ;;  %v5362_v18 = vsub.f32 %v5103_v14, %v6678_v32  ;;  %v6681_v32 = vand.u32 4294901760, %v5119_v12 }
  0x75   :  { %4183 = vmatprep.subr.bf16.mxu1 %v6644_v15  ;;  %v5295_v58 = vpack.c.bf16 %v6660_v23, %v6659_v29  ;;  %v6664_v29 = vand.u32 4294901760, %v5265_v49  ;;  %v6665_v23 = vand.u32 4294901760, %v5267_v41  ;;  %v5318_v52 = vsub.f32 %v5091_v43, %v6666_v22 }
  0x76   :  { %4277 = vmatpush3.bf16.msra.mxu0 %v5188_v34  ;;  %v6663_v34 = vld [vmem:[#allocation17_spill] sm:$0xff]  ;;  %v6672_v43 = vand.u32 4294901760, %v5279_v30 }
  0x77   :  { %4279 = vmatprep.subr.bf16.mxu0 %v5197_v24  ;;  %6661 = vst [vmem:[#allocation30_spill] sm:$0xff] %v5295_v58 }
  0x78   :  { %4185 = vmatpush3.bf16.msra.mxu1 %v6648_v54  ;;  %v1133_v22 = vsub.f32 %v5279_v30, %v6672_v43  ;;  %v6677_v43 = vand.u32 4294901760, %v5101_v28 }
  0x79   :  { %4187 = vmatprep.subr.bf16.mxu1 %v6649_v59 }
  0x7a   :  { %4281 = vmatpush3.bf16.msra.mxu0 %v5218_v37  ;;  %v6657_v37 = vand.u32 4294901760, %v5233_v40  ;;  %v5357_v30 = vsub.f32 %v5101_v28, %v6677_v43 }
  0x7b   :  { %4283 = vmatprep.subr.bf16.mxu0 %v5227_v38  ;;  %v5275_v38 = vld [vmem:[#allocation5 + $0x1f8] sm:$0xff] }
  0x7c   :  { %4189 = vmatpush3.bf16.msra.mxu1 %v6653_v10  ;;  %v5286_v24 = vpack.c.bf16 %v6657_v37, %v6656_v61  ;;  %v5301_v61 = vld [vmem:[#allocation5 + $0x178] sm:$0xff]  ;;  %v6662_v37 = vld [vmem:[#allocation16_spill] sm:$0xff] }
  0x7d   :  { %4191 = vmatprep.subr.bf16.mxu1 %v6654_v17 }
  0x7e   :  { %4285 = vmatpush3.bf16.msra.mxu0 %v5252_v3  ;;  %6658 = vst [vmem:[#allocation15_spill] sm:$0xff] %v5286_v24  ;;  %v5311_v3 = vpack.c.bf16 %v6665_v23, %v6664_v29  ;;  %v6669_v29 = vand.u32 4294901760, %v5275_v38 }
  0x7f   :  { %4287 = vmatprep.subr.bf16.mxu0 %v5261_v33  ;;  %v6671_v33 = vld [vmem:[#allocation19_spill] sm:$0xff] }
  0x80   :  { %4193 = vmatpush3.bf16.msra.mxu1 %v6662_v37 }
  0x81   :  { %4195 = vmatprep.subr.bf16.mxu1 %v6663_v34 }
  0x82   :  { %4289 = vmatpush3.bf16.msra.mxu0 %v5286_v24  ;;  %v6668_v24 = vand.u32 4294901760, %v5273_v46 }
  0x83   :  { %4291 = vmatprep.subr.bf16.mxu0 %v5295_v58  ;;  %v5345_v58 = vsub.f32 %v5099_v50, %v6674_v25  ;;  %v4330_v50 = vpack.c.bf16 %v5323_v4, %v5318_v52  ;;  %v1134_v25 = vand.u32 4294901760, %v1133_v22  ;;  %v6682_v22 = vand.u32 4294901760, %v5121_v35 }
  0x84   :  { %v5330_v23 = vpack.c.bf16 %v6669_v29, %v6668_v24  ;;  %4197 = vmatpush3.bf16.msra.mxu1 %v6670_v63  ;;  %v6675_v24 = vand.u32 4294901760, %v5299_v57  ;;  %v6676_v29 = vand.u32 4294901760, %v5301_v61 }
  0x85   :  { %4199 = vmatprep.subr.bf16.mxu1 %v6671_v33  ;;  %v4332_v43 = vpack.c.bf16 %v5345_v58, %v5340_v8 }
  0x86   :  { %4293 = vmatpush3.bf16.msra.mxu0 %v5311_v3  ;;  %v5352_v53 = vpack.c.bf16 %v6676_v29, %v6675_v24  ;;  %v6679_v24 = vand.u32 4294901760, %v5115_v47  ;;  %v6680_v29 = vand.u32 4294901760, %v5117_v62 }
  0x87   :  { %4295 = vmatprep.subr.bf16.mxu0 %v5330_v23 }
  0x88   :  { %4201 = vmatpush3.bf16.msra.mxu1 %v4993_v44  ;;  %v5372_v28 = vsub.f32 %v5115_v47, %v6679_v24  ;;  %v5377_v14 = vsub.f32 %v5117_v62, %v6680_v29  ;;  %v5390_v47 = vsub.f32 %v5121_v35, %v6682_v22  ;;  %v6683_v24 = vand.u32 4294901760, %v5004_v5 }
  0x89   :  { %4235 = vmatprep.subr.bf16.mxu1 %v4853_v13  ;;  %v5385_v13 = vsub.f32 %v5119_v12, %v6681_v32  ;;  %v4334_v62 = vpack.c.bf16 %v5362_v18, %v5357_v30  ;;  %v6684_v12 = vand.u32 4294901760, %v5142_v11  ;;  %v6685_v35 = vand.u32 4294901760, %v5144_v20 }
  0x8a   :  { %4297 = vmatpush3.bf16.msra.mxu0 %v5352_v53  ;;  %v6690_v22 = vand.u32 4294901760, %v5178_v1 }
  0x8b   :  { %751 = vmatmul.mubr.f32.vlgmr.msra.gmra.mrb[4].mxu1 %v6683_v24  ;;  %4331 = vmatprep.subr.bf16.mxu0 %v4330_v50  ;;  %v5402_v29 = vsub.f32 %v5142_v11, %v6684_v12  ;;  %v5407_v5 = vsub.f32 %v5144_v20, %v6685_v35  ;;  %v4336_v50 = vpack.c.bf16 %v5377_v14, %v5372_v28  ;;  %v6694_v35 = vand.u32 4294901760, %v5206_v27 }
  0x8c   :  { %4237 = vmatpush3.bf16.msra.mxu1 %v4861_v19  ;;  %1021 = vmatprep.mubr.f32.mxu1 %v4982_v42  ;;  %v6686_v19 = vand.u32 4294901760, %v5147_v56  ;;  %v6687_v42 = vand.u32 4294901760, %v5149_v55  ;;  %v4338_v20 = vpack.c.bf16 %v5390_v47, %v5385_v13 }
  0x8d   :  { %1135 = vmatmul.mubr.f32.vlgmr.msra.gmra.mrb[4].mxu0 %v1134_v25  ;;  %4239 = vmatprep.subr.bf16.mxu1 %v4865_v21  ;;  %v6688_v25 = vand.u32 4294901760, %v5173_v2 }
  0x8e   :  { %4333 = vmatpush3.bf16.msra.mxu0 %v4332_v43  ;;  %1502 = vmatprep.mubr.f32.mxu0 %v5236_v9  ;;  %v5415_v21 = vsub.f32 %v5147_v56, %v6686_v19  ;;  %v5420_v11 = vsub.f32 %v5149_v55, %v6687_v42  ;;  %v6689_v56 = vand.u32 4294901760, %v5175_v7  ;;  %v4340_v55 = vpack.c.bf16 %v5407_v5, %v5402_v29 }
  0x8f   :  { %4335 = vmatprep.subr.bf16.mxu0 %v4334_v62  ;;  %v5429_v43 = vsub.f32 %v5173_v2, %v6688_v25  ;;  %v1262_v19 = vand.u32 4294901760, %v5323_v4  ;;  %v6696_v42 = vand.u32 4294901760, %v5231_v60  ;;  %v1143_v25 = vand.u32 4294901760, %v5340_v8 }
  0x90   :  { %4241 = vmatpush3.bf16.msra.mxu1 %v4883_v39  ;;  %v5434_v32 = vsub.f32 %v5175_v7, %v6689_v56  ;;  %v5441_v39 = vsub.f32 %v5178_v1, %v6690_v22  ;;  %v4342_v2 = vpack.c.bf16 %v5420_v11, %v5415_v21  ;;  %v6692_v7 = vand.u32 4294901760, %v5201_v36 }
  0x91   :  { %4243 = vmatprep.subr.bf16.mxu1 %v4889_v45  ;;  %v6691_v45 = vand.u32 4294901760, %v5180_v26  ;;  %v6693_v1 = vand.u32 4294901760, %v5203_v6  ;;  %v1150_v56 = vand.u32 4294901760, %v5345_v58 }
  0x92   :  { %4337 = vmatpush3.bf16.msra.mxu0 %v4336_v50  ;;  %v5455_v62 = vsub.f32 %v5201_v36, %v6692_v7  ;;  %v1269_v7 = vand.u32 4294901760, %v5357_v30 }
  0x93   :  { %v5446_v24 = vsub.f32 %v5180_v26, %v6691_v45  ;;  %4339 = vmatprep.subr.bf16.mxu0 %v4338_v20  ;;  %v5460_v12 = vsub.f32 %v5203_v6, %v6693_v1  ;;  %v4344_v26 = vpack.c.bf16 %v5434_v32, %v5429_v43  ;;  %v1255_v6 = vand.u32 4294901760, %v5318_v52 }
  0x94   :  { %4245 = vmatpush3.bf16.msra.mxu1 %v4898_v51  ;;  %v5467_v51 = vsub.f32 %v5206_v27, %v6694_v35  ;;  %v5482_v27 = vsub.f32 %v5231_v60, %v6696_v42  ;;  %v6700_v1 = vand.u32 4294901760, %v5265_v49  ;;  %v1144_v42 = vsub.f32 %v5340_v8, %v1143_v25 }
  0x95   :  { %4247 = vmatprep.subr.bf16.mxu1 %v6644_v15  ;;  %v6695_v15 = vand.u32 4294901760, %v5208_v31  ;;  %v4346_v36 = vpack.c.bf16 %v5446_v24, %v5441_v39  ;;  %v1256_v45 = vsub.f32 %v5318_v52, %v1255_v6  ;;  %v1270_v8 = vsub.f32 %v5357_v30, %v1269_v7 }
  0x96   :  { %4341 = vmatpush3.bf16.msra.mxu0 %v4340_v55  ;;  %v6698_v55 = vand.u32 4294901760, %v5239_v48  ;;  %v1297_v30 = vand.u32 4294901760, %v5415_v21 }
  0x97   :  { %v5472_v50 = vsub.f32 %v5208_v31, %v6695_v15  ;;  %4343 = vmatprep.subr.bf16.mxu0 %v4342_v2  ;;  %v6697_v31 = vand.u32 4294901760, %v5233_v40  ;;  %v1263_v2 = vsub.f32 %v5323_v4, %v1262_v19  ;;  %v6703_v4 = vand.u32 4294901760, %v5275_v38 }
  0x98   :  { %4249 = vmatpush3.bf16.msra.mxu1 %v6648_v54  ;;  %v4348_v54 = vpack.c.bf16 %v5460_v12, %v5455_v62  ;;  %v5497_v60 = vsub.f32 %v5239_v48, %v6698_v55  ;;  %v1276_v48 = vand.u32 4294901760, %v5362_v18  ;;  %v1257_v55 = vand.u32 4294901760, %v1256_v45 }
  0x99   :  { %4251 = vmatprep.subr.bf16.mxu1 %v6649_v59  ;;  %v5488_v20 = vsub.f32 %v5233_v40, %v6697_v31  ;;  %v6699_v59 = vand.u32 4294901760, %v5241_v16  ;;  %v4350_v40 = vpack.c.bf16 %v5472_v50, %v5467_v51  ;;  %v5529_v15 = vsub.f32 %v5275_v38, %v6703_v4 }
  0x9a   :  { %4345 = vmatpush3.bf16.msra.mxu0 %v4344_v26  ;;  %v5514_v26 = vsub.f32 %v5265_v49, %v6700_v1  ;;  %v6704_v49 = vand.u32 4294901760, %v5299_v57  ;;  %v6705_v31 = vand.u32 4294901760, %v5301_v61  ;;  %v1283_v1 = vand.u32 4294901760, %v5385_v13 }
  0x9b   :  { %v5502_v22 = vsub.f32 %v5241_v16, %v6699_v59  ;;  %4347 = vmatprep.subr.bf16.mxu0 %v4346_v36  ;;  %v6701_v16 = vand.u32 4294901760, %v5267_v41  ;;  %v1264_v59 = vand.u32 4294901760, %v1263_v2  ;;  %v1171_v2 = vand.u32 4294901760, %v5402_v29 }
  0x9c   :  { %4253 = vmatpush3.bf16.msra.mxu1 %v6653_v10  ;;  %v6702_v10 = vand.u32 4294901760, %v5273_v46  ;;  %v5535_v36 = vsub.f32 %v5299_v57, %v6704_v49  ;;  %v5544_v38 = vsub.f32 %v5301_v61, %v6705_v31  ;;  %v1157_v57 = vand.u32 4294901760, %v5372_v28 }
  0x9d   :  { %v5519_v35 = vsub.f32 %v5267_v41, %v6701_v16  ;;  %4255 = vmatprep.subr.bf16.mxu1 %v6654_v17  ;;  %v4352_v41 = vpack.c.bf16 %v5488_v20, %v5482_v27  ;;  %v4354_v17 = vpack.c.bf16 %v5502_v22, %v5497_v60  ;;  %v1290_v16 = vand.u32 4294901760, %v5390_v47 }
  0x9e   :  { %v5524_v52 = vsub.f32 %v5273_v46, %v6702_v10  ;;  %4349 = vmatpush3.bf16.msra.mxu0 %v4348_v54  ;;  %v1151_v46 = vsub.f32 %v5345_v58, %v1150_v56  ;;  %v1164_v54 = vand.u32 4294901760, %v5377_v14  ;;  %v1277_v58 = vsub.f32 %v5362_v18, %v1276_v48 }
  0x9f   :  { %4351 = vmatprep.subr.bf16.mxu0 %v4350_v40  ;;  %v4356_v61 = vpack.c.bf16 %v5519_v35, %v5514_v26  ;;  %v4394_v18 = vpack.c.bf16 %v1262_v19, %v1255_v6  ;;  %v1158_v10 = vsub.f32 %v5372_v28, %v1157_v57  ;;  %v4298_v49 = vpack.c.bf16 %v1264_v59, %v1257_v55 }
  0xa0   :  { %4257 = vmatpush3.bf16.msra.mxu1 %v6662_v37  ;;  %v4358_v40 = vpack.c.bf16 %v5529_v15, %v5524_v52  ;;  %v1145_v37 = vand.u32 4294901760, %v1144_v42  ;;  %v1152_v45 = vand.u32 4294901760, %v1151_v46  ;;  %v1165_v4 = vsub.f32 %v5377_v14, %v1164_v54 }
  0xa1   :  { %4259 = vmatprep.subr.bf16.mxu1 %v6663_v34  ;;  %v4360_v34 = vpack.c.bf16 %v5544_v38, %v5535_v36  ;;  %v4396_v31 = vpack.c.bf16 %v1150_v56, %v1143_v25  ;;  %v1278_v42 = vand.u32 4294901760, %v1277_v58  ;;  %v1284_v46 = vsub.f32 %v5385_v13, %v1283_v1 }
  0xa2   :  { %4353 = vmatpush3.bf16.msra.mxu0 %v4352_v41  ;;  %v1271_v41 = vand.u32 4294901760, %v1270_v8  ;;  %v1304_v6 = vand.u32 4294901760, %v5420_v11  ;;  %v4300_v28 = vpack.c.bf16 %v1152_v45, %v1145_v37  ;;  %v4398_v19 = vpack.c.bf16 %v1276_v48, %v1269_v7 }
  0xa3   :  { %4355 = vmatprep.subr.bf16.mxu0 %v4354_v17  ;;  %v1291_v17 = vsub.f32 %v5390_v47, %v1290_v16  ;;  %v6706_v14 = vand.u32 4294901760, %v5407_v5  ;;  %v1166_v13 = vand.u32 4294901760, %v1165_v4  ;;  %v4400_v56 = vpack.c.bf16 %v1164_v54, %v1157_v57 }
  0xa4   :  { %4261 = vmatpush3.bf16.msra.mxu1 %v6670_v63  ;;  %v1172_v63 = vsub.f32 %v5402_v29, %v1171_v2  ;;  %v1185_v47 = vand.u32 4294901760, %v5429_v43  ;;  %v4302_v55 = vpack.c.bf16 %v1278_v42, %v1271_v41  ;;  %v1192_v59 = vand.u32 4294901760, %v5434_v32  ;;  %v6708_v42 = vld [vmem:[#allocation14_spill] sm:$0xff] }
  0xa5   :  { %4263 = vmatprep.subr.bf16.mxu1 %v6671_v33  ;;  %v1179_v25 = vsub.f32 %v5407_v5, %v6706_v14  ;;  %v1159_v33 = vand.u32 4294901760, %v1158_v10  ;;  %v1311_v7 = vand.u32 4294901760, %v5441_v39  ;;  %v1318_v48 = vand.u32 4294901760, %v5446_v24 }
  0xa6   :  { %4357 = vmatpush3.bf16.msra.mxu0 %v4356_v61  ;;  %v1285_v8 = vand.u32 4294901760, %v1284_v46  ;;  %v1292_v58 = vand.u32 4294901760, %v1291_v17  ;;  %v1298_v61 = vsub.f32 %v5415_v21, %v1297_v30  ;;  %v1305_v57 = vsub.f32 %v5420_v11, %v1304_v6 }
  0xa7   :  { %4359 = vmatprep.subr.bf16.mxu0 %v4358_v40  ;;  %v1180_v54 = vand.u32 4294901760, %v1179_v25  ;;  %v1199_v40 = vand.u32 4294901760, %v5455_v62  ;;  %v1206_v37 = vand.u32 4294901760, %v5460_v12  ;;  %v4304_v45 = vpack.c.bf16 %v1166_v13, %v1159_v33 }
  0xa8   :  { %4265 = vmatpush3.bf16.msra.mxu1 %v4993_v44  ;;  %v1173_v44 = vand.u32 4294901760, %v1172_v63  ;;  %v1186_v10 = vsub.f32 %v5429_v43, %v1185_v47  ;;  %v1325_v4 = vand.u32 4294901760, %v5467_v51  ;;  %v1312_v41 = vsub.f32 %v5441_v39, %v1311_v7 }
  0xa9   :  { %4299 = vmatprep.subr.bf16.mxu1 %v4298_v49  ;;  %v6560_v49 = vand.u32 4294901760, %v5472_v50  ;;  %v4306_v46 = vpack.c.bf16 %v1292_v58, %v1285_v8  ;;  %v4402_v17 = vpack.c.bf16 %v1290_v16, %v1283_v1  ;;  %v1306_v63 = vand.u32 4294901760, %v1305_v57 }
  0xaa   :  { %4361 = vmatpush3.bf16.msra.mxu0 %v4360_v34  ;;  %v1193_v34 = vsub.f32 %v5434_v32, %v1192_v59  ;;  %v4308_v14 = vpack.c.bf16 %v1180_v54, %v1173_v44  ;;  %v1200_v25 = vsub.f32 %v5455_v62, %v1199_v40  ;;  %v1207_v33 = vsub.f32 %v5460_v12, %v1206_v37 }
  0xab   :  { %1023 = vmatmul.mubr.f32.vlgmr.msra.gmra.mrb[6].mxu1 %v4990_v0  ;;  %4395 = vmatprep.subr.bf16.mxu0 %v4394_v18  ;;  %v1319_v0 = vsub.f32 %v5446_v24, %v1318_v48  ;;  %v6707_v18 = vld [vmem:[#allocation11_spill] sm:$0xff]  ;;  %v1326_v13 = vsub.f32 %v5467_v51, %v1325_v4  ;;  %v1333_v1 = vsub.f32 %v5472_v50, %v6560_v49  ;;  %v1213_v16 = vand.u32 4294901760, %v5482_v27 }
  0xac   :  { %4301 = vmatpush3.bf16.msra.mxu1 %v4300_v28  ;;  %1365 = vmatprep.mubr.f32.mxu1 %v6707_v18  ;;  %v1299_v28 = vand.u32 4294901760, %v1298_v61  ;;  %v1194_v8 = vand.u32 4294901760, %v1193_v34  ;;  %v1313_v58 = vand.u32 4294901760, %v1312_v41  ;;  %v1346_v44 = vand.u32 4294901760, %v5502_v22 }
  0xad   :  { %1505 = vmatmul.mubr.f32.vlgmr.msra.gmra.mrb[6].mxu0 %v6708_v42  ;;  %4303 = vmatprep.subr.bf16.mxu1 %v4302_v55  ;;  %v1187_v55 = vand.u32 4294901760, %v1186_v10  ;;  %v1320_v61 = vand.u32 4294901760, %v1319_v0  ;;  %v6709_v54 = vand.u32 4294901760, %v5407_v5  ;;  %v1201_v10 = vand.u32 4294901760, %v1200_v25 }
  0xae   :  { %4397 = vmatpush3.bf16.msra.mxu0 %v4396_v31  ;;  %1779 = vmatprep.mubr.f32.mxu0 %v6707_v18  ;;  %v1220_v31 = vand.u32 4294901760, %v5488_v20  ;;  %v4310_v57 = vpack.c.bf16 %v1306_v63, %v1299_v28  ;;  %v1208_v34 = vand.u32 4294901760, %v1207_v33  ;;  %v1327_v41 = vand.u32 4294901760, %v1326_v13  ;;  %v46_v33 = vld [vmem:[#allocation2 + $0x28] sm:$0xff] }
  0xaf   :  { %4399 = vmatprep.subr.bf16.mxu0 %v4398_v19  ;;  %v1339_v19 = vand.u32 4294901760, %v5497_v60  ;;  %v4404_v49 = vpack.c.bf16 %v6709_v54, %v1171_v2  ;;  %v1334_v0 = vand.u32 4294901760, %v1333_v1  ;;  %v4312_v5 = vpack.c.bf16 %v1194_v8, %v1187_v55  ;;  %v5687_v54 = vld [vmem:[#allocation5 + $0x208] sm:$0xff] }
  0xb0   :  { %4305 = vmatpush3.bf16.msra.mxu1 %v4304_v45  ;;  %v4406_v45 = vpack.c.bf16 %v1304_v6, %v1297_v30  ;;  %v1221_v29 = vsub.f32 %v5488_v20, %v1220_v31  ;;  %v4314_v2 = vpack.c.bf16 %v1320_v61, %v1313_v58  ;;  %v1227_v21 = vand.u32 4294901760, %v5514_v26  ;;  %v5680_v61 = vld [vmem:[#allocation5 + $0x288] sm:$0xff] }
  0xb1   :  { %4307 = vmatprep.subr.bf16.mxu1 %v4306_v46  ;;  %v1214_v46 = vsub.f32 %v5482_v27, %v1213_v16  ;;  %v1234_v11 = vand.u32 4294901760, %v5519_v35  ;;  %v1340_v30 = vsub.f32 %v5497_v60, %v1339_v19  ;;  %v1347_v6 = vsub.f32 %v5502_v22, %v1346_v44 }
  0xb2   :  { %4401 = vmatpush3.bf16.msra.mxu0 %v4400_v56  ;;  %v1353_v56 = vand.u32 4294901760, %v5524_v52  ;;  %v4408_v28 = vpack.c.bf16 %v1192_v59, %v1185_v47  ;;  %v4410_v63 = vpack.c.bf16 %v1318_v48, %v1311_v7  ;;  %v4318_v60 = vpack.c.bf16 %v1334_v0, %v1327_v41 }
  0xb3   :  { %4403 = vmatprep.subr.bf16.mxu0 %v4402_v17  ;;  %v1360_v17 = vand.u32 4294901760, %v5529_v15  ;;  %v1215_v25 = vand.u32 4294901760, %v1214_v46  ;;  %v1222_v22 = vand.u32 4294901760, %v1221_v29  ;;  %v1228_v13 = vsub.f32 %v5514_v26, %v1227_v21 }
  0xb4   :  { %4309 = vmatpush3.bf16.msra.mxu1 %v4308_v14  ;;  %v4316_v14 = vpack.c.bf16 %v1208_v34, %v1201_v10  ;;  %v1241_v43 = vand.u32 4294901760, %v5535_v36  ;;  %v1248_v32 = vand.u32 4294901760, %v5544_v38  ;;  %v1341_v39 = vand.u32 4294901760, %v1340_v30  ;;  %v5689_v10 = vld [vmem:[#allocation5 + $0x290] sm:$0xff]  ;;  %v5691_v34 = vld [vmem:[#allocation5 + $0x298] sm:$0xff] }
  0xb5   :  { %4311 = vmatprep.subr.bf16.mxu1 %v4310_v57  ;;  %v1348_v47 = vand.u32 4294901760, %v1347_v6  ;;  %v1354_v24 = vsub.f32 %v5524_v52, %v1353_v56  ;;  %v1361_v59 = vsub.f32 %v5529_v15, %v1360_v17  ;;  %v4412_v7 = vpack.c.bf16 %v1206_v37, %v1199_v40  ;;  %v5708_v30 = vld [vmem:[#allocation5 + $0x218] sm:$0xff]  ;;  %v5710_v6 = vld [vmem:[#allocation5 + $0x2a0] sm:$0xff] }
  0xb6   :  { %4405 = vmatpush3.bf16.msra.mxu0 %v4404_v49  ;;  %v1235_v49 = vsub.f32 %v5519_v35, %v1234_v11  ;;  %v5663_v26 = vand.u32 4294901760, %v46_v33  ;;  %v4320_v35 = vpack.c.bf16 %v1222_v22, %v1215_v25  ;;  %v6711_v48 = vand.u32 4294901760, %v5472_v50  ;;  %v6716_v25 = vld [vmem:[#allocation12_spill] sm:$0xff] }
  0xb7   :  { %4407 = vmatprep.subr.bf16.mxu0 %v4406_v45  ;;  %v1229_v55 = vand.u32 4294901760, %v1228_v13  ;;  %v1242_v15 = vsub.f32 %v5535_v36, %v1241_v43  ;;  %v1249_v8 = vsub.f32 %v5544_v38, %v1248_v32  ;;  %v4322_v62 = vpack.c.bf16 %v1348_v47, %v1341_v39  ;;  %v5678_v38 = vld [vmem:[#allocation5 + $0x280] sm:$0xff]  ;;  %v5738_v39 = vld [vmem:[#allocation5 + $0x2b0] sm:$0xff]  ;;  %v5740_v47 = vld [vmem:[#allocation5 + $0x2b8] sm:$0xff] }
  0xb8   :  { %4313 = vmatpush3.bf16.msra.mxu1 %v4312_v5  ;;  %6710 = vst [vmem:[#allocation16_spill] sm:$0xff] %v5663_v26  ;;  %v4414_v1 = vpack.c.bf16 %v6711_v48, %v1325_v4  ;;  %v1236_v52 = vand.u32 4294901760, %v1235_v49  ;;  %v1355_v12 = vand.u32 4294901760, %v1354_v24  ;;  %v1362_v40 = vand.u32 4294901760, %v1361_v59  ;;  %v5733_v49 = vld [vmem:[#allocation5 + $0x220] sm:$0xff]  ;;  %v6720_v59 = vld [vmem:[#allocation22_spill] sm:$0xff] }
  0xb9   :  { %4315 = vmatprep.subr.bf16.mxu1 %v4314_v2  ;;  %v4416_v51 = vpack.c.bf16 %v1220_v31, %v1213_v16  ;;  %v5676_v50 = vsub.f32 %v46_v33, %v5663_v26  ;;  %v4418_v37 = vpack.c.bf16 %v1346_v44, %v1339_v19  ;;  %v1243_v36 = vand.u32 4294901760, %v1242_v15  ;;  %v5685_v44 = vld [vmem:[#allocation5 + $0x200] sm:$0xff]  ;;  %v5766_v15 = vld [vmem:[#allocation5 + $0x238] sm:$0xff] }
  0xba   :  { %4409 = vmatpush3.bf16.msra.mxu0 %v4408_v28  ;;  %v4324_v4 = vpack.c.bf16 %v1236_v52, %v1229_v55  ;;  %v1250_v58 = vand.u32 4294901760, %v1249_v8  ;;  %v4326_v57 = vpack.c.bf16 %v1362_v40, %v1355_v12  ;;  %v4420_v27 = vpack.c.bf16 %v1234_v11, %v1227_v21  ;;  %v5706_v11 = vld [vmem:[#allocation5 + $0x210] sm:$0xff]  ;;  %v6723_v8 = vld [vmem:[#allocation23_spill] sm:$0xff]  ;;  %v5771_v12 = vld [vmem:[#allocation5 + $0x2c8] sm:$0xff] }
  0xbb   :  { %4411 = vmatprep.subr.bf16.mxu0 %v4410_v63  ;;  %6712 = vst [vmem:[#allocation17_spill] sm:$0xff] %v5676_v50  ;;  %v6561_v20 = vand.u32 4294901760, %v5676_v50  ;;  %v4422_v16 = vpack.c.bf16 %v1360_v17, %v1353_v56  ;;  %v6579_v31 = vand.u32 4294901760, %v5678_v38  ;;  %v6578_v19 = vand.u32 4294901760, %v5680_v61  ;;  %v5712_v56 = vld [vmem:[#allocation5 + $0x2a8] sm:$0xff]  ;;  %v5764_v52 = vld [vmem:[#allocation5 + $0x230] sm:$0xff] }
  0xbc   :  { %4317 = vmatpush3.bf16.msra.mxu1 %v4316_v14  ;;  %v4328_v45 = vpack.c.bf16 %v1250_v58, %v1243_v36  ;;  %v4424_v41 = vpack.c.bf16 %v1248_v32, %v1241_v43  ;;  %v6577_v0 = vand.u32 4294901760, %v5685_v44  ;;  %v6576_v46 = vand.u32 4294901760, %v5687_v54  ;;  %v6714_v17 = vld [vmem:[#allocation20_spill] sm:$0xff]  ;;  %v6718_v32 = vld [vmem:[#allocation21_spill] sm:$0xff] }
  0xbd   :  { %4319 = vmatprep.subr.bf16.mxu1 %v4318_v60  ;;  %v1989_v29 = vsub.f32 %v5676_v50, %v6561_v20  ;;  %v5702_v5 = vpack.c.bf16 %v6578_v19, %v6579_v31  ;;  %v6573_v2 = vand.u32 4294901760, %v5689_v10  ;;  %v6572_v21 = vand.u32 4294901760, %v5691_v34  ;;  %v5735_v43 = vld [vmem:[#allocation5 + $0x228] sm:$0xff]  ;;  %v6746_v19 = vld [vmem:[#allocation30_spill] sm:$0xff] }
  0xbe   :  { %4413 = vmatpush3.bf16.msra.mxu0 %v4412_v7  ;;  %v5719_v28 = vpack.c.bf16 %v6576_v46, %v6577_v0  ;;  %v6571_v63 = vand.u32 4294901760, %v5706_v11  ;;  %v6570_v14 = vand.u32 4294901760, %v5708_v30  ;;  %v6567_v33 = vand.u32 4294901760, %v5710_v6  ;;  %v6724_v40 = vld [vmem:[#allocation24_spill] sm:$0xff]  ;;  %v5857_v46 = vld [vmem:[#allocation5 + $0x2f8] sm:$0xff] }
  0xbf   :  { %4415 = vmatprep.subr.bf16.mxu0 %v4414_v1  ;;  %6713 = vst [vmem:[#allocation18_spill] sm:$0xff] %v5702_v5  ;;  %v1990_v60 = vand.u32 4294901760, %v1989_v29  ;;  %v5729_v22 = vpack.c.bf16 %v6572_v21, %v6573_v2  ;;  %v6566_v13 = vand.u32 4294901760, %v5712_v56  ;;  %v6719_v24 = vand.u32 4294901760, %v5236_v9  ;;  %v5799_v29 = vld [vmem:[#allocation5 + $0x2d8] sm:$0xff]  ;;  %v6732_v21 = vld [vmem:[#allocation28_spill] sm:$0xff] }
  0xc0   :  { %4321 = vmatpush3.bf16.msra.mxu1 %v4320_v35  ;;  %6715 = vst [vmem:[#allocation19_spill] sm:$0xff] %v5719_v28  ;;  %v5751_v7 = vpack.c.bf16 %v6570_v14, %v6571_v63  ;;  %v6565_v35 = vand.u32 4294901760, %v5733_v49  ;;  %v6564_v48 = vand.u32 4294901760, %v5735_v43  ;;  %v6563_v1 = vand.u32 4294901760, %v5738_v39  ;;  %v5825_v14 = vld [vmem:[#allocation5 + $0x2e0] sm:$0xff]  ;;  %v5827_v63 = vld [vmem:[#allocation5 + $0x2e8] sm:$0xff] }
  0xc1   :  { %4323 = vmatprep.subr.bf16.mxu1 %v4322_v62  ;;  %6717 = vst [vmem:[#allocation11_spill] sm:$0xff] %v5729_v22  ;;  %v5760_v9 = vpack.c.bf16 %v6566_v13, %v6567_v33  ;;  %v6562_v55 = vand.u32 4294901760, %v5740_v47  ;;  %v5769_v62 = vld [vmem:[#allocation5 + $0x2c0] sm:$0xff]  ;;  %v6588_v13 = vand.u32 4294901760, %v5799_v29  ;;  %v5820_v33 = vld [vmem:[#allocation5 + $0x250] sm:$0xff]  ;;  %v6751_v26 = vand.u32 4294901760, %v5680_v61 }
  0xc2   :  { %4417 = vmatpush3.bf16.msra.mxu0 %v4416_v51  ;;  %6721 = vst [vmem:[#allocation14_spill] sm:$0xff] %v5751_v7  ;;  %v5779_v51 = vpack.c.bf16 %v6564_v48, %v6565_v35  ;;  %v6575_v58 = vand.u32 4294901760, %v5769_v62 }
  0xc3   :  { %4419 = vmatprep.subr.bf16.mxu0 %v4418_v37  ;;  %6722 = vst [vmem:[#allocation20_spill] sm:$0xff] %v5760_v9  ;;  %v6569_v37 = vand.u32 4294901760, %v5764_v52  ;;  %v5788_v36 = vpack.c.bf16 %v6562_v55, %v6563_v1  ;;  %v45_v1 = vld [vmem:[#allocation2 + $0x20] sm:$0xff] }
  0xc4   :  { %4325 = vmatpush3.bf16.msra.mxu1 %v4324_v4  ;;  %6725 = vst [vmem:[#allocation12_spill] sm:$0xff] %v5779_v51  ;;  %v6568_v4 = vand.u32 4294901760, %v5766_v15  ;;  %v5830_v2 = vand.u32 4294901760, %v45_v1 }
  0xc5   :  { %4327 = vmatprep.subr.bf16.mxu1 %v4326_v57  ;;  %6726 = vst [vmem:[#allocation21_spill] sm:$0xff] %v5788_v36  ;;  %v6574_v57 = vand.u32 4294901760, %v5771_v12 }
  0xc6   :  { %4421 = vmatpush3.bf16.msra.mxu0 %v4420_v27  ;;  %v5792_v27 = vld [vmem:[#allocation5 + $0x240] sm:$0xff]  ;;  %6733 = vst [vmem:[#allocation24_spill] sm:$0xff] %v5830_v2 }
  0xc7   :  { %4423 = vmatprep.subr.bf16.mxu0 %v4422_v16  ;;  %v5794_v16 = vld [vmem:[#allocation5 + $0x248] sm:$0xff]  ;;  %v6583_v20 = vand.u32 4294901760, %v5792_v27  ;;  %v5816_v48 = vpack.c.bf16 %v6574_v57, %v6575_v58  ;;  %v5855_v58 = vld [vmem:[#allocation5 + $0x2f0] sm:$0xff] }
  0xc8   :  { %4329 = vmatpush3.bf16.msra.mxu1 %v4328_v45  ;;  %v6727_v45 = vld [vmem:[#allocation25_spill] sm:$0xff]  ;;  %v6582_v55 = vand.u32 4294901760, %v5794_v16 }
  0xc9   :  { %4363 = vmatprep.subr.bf16.mxu1 %v6714_v17  ;;  %6730 = vst [vmem:[#allocation23_spill] sm:$0xff] %v5816_v48 }
  0xca   :  { %4425 = vmatpush3.bf16.msra.mxu0 %v4424_v41  ;;  %v5797_v41 = vld [vmem:[#allocation5 + $0x2d0] sm:$0xff]  ;;  %v5837_v57 = vpack.c.bf16 %v6582_v55, %v6583_v20  ;;  %v5852_v55 = vld [vmem:[#allocation5 + $0x268] sm:$0xff] }
  0xcb   :  { %1367 = vmatmul.mubr.f32.vlgmr.msra.gmra.mrb[8].mxu1 %v6716_v25  ;;  %4459 = vmatprep.subr.bf16.mxu0 %v5702_v5  ;;  %v6589_v35 = vand.u32 4294901760, %v5797_v41  ;;  %v6736_v20 = vld [vmem:[#allocation13_spill] sm:$0xff] }
  0xcc   :  { %4365 = vmatpush3.bf16.msra.mxu1 %v6718_v32  ;;  %1609 = vmatprep.mubr.f32.mxu1 %v6719_v24  ;;  %v5807_v24 = vpack.c.bf16 %v6568_v4, %v6569_v37  ;;  %v5822_v4 = vld [vmem:[#allocation5 + $0x258] sm:$0xff]  ;;  %v6731_v37 = vld [vmem:[#allocation27_spill] sm:$0xff]  ;;  %6734 = vst [vmem:[#allocation25_spill] sm:$0xff] %v5837_v57 }
  0xcd   :  { %1781 = vmatmul.mubr.f32.vlgmr.msra.gmra.mrb[8].mxu0 %v6716_v25  ;;  %4367 = vmatprep.subr.bf16.mxu1 %v6720_v59  ;;  %v5846_v0 = vpack.c.bf16 %v6588_v13, %v6589_v35  ;;  %v6739_v13 = vand.u32 4294901760, %v5820_v33  ;;  %v6740_v35 = vand.u32 4294901760, %v5822_v4 }
  0xce   :  { %4461 = vmatpush3.bf16.msra.mxu0 %v5719_v28  ;;  %1991 = vmatprep.mubr.f32.mxu0 %v1990_v60  ;;  %v6728_v60 = vld [vmem:[#allocation26_spill] sm:$0xff]  ;;  %6729 = vst [vmem:[#allocation22_spill] sm:$0xff] %v5807_v24  ;;  %v5881_v28 = vld [vmem:[#allocation5 + $0x270] sm:$0xff] }
  0xcf   :  { %4463 = vmatprep.subr.bf16.mxu0 %v5729_v22  ;;  %6735 = vst [vmem:[#allocation26_spill] sm:$0xff] %v5846_v0  ;;  %v5868_v31 = vpack.c.bf16 %v6740_v35, %v6739_v13  ;;  %v5883_v13 = vld [vmem:[#allocation5 + $0x278] sm:$0xff]  ;;  %v6745_v35 = vld [vmem:[#allocation15_spill] sm:$0xff] }
  0xd0   :  { %4369 = vmatpush3.bf16.msra.mxu1 %v6723_v8 }
  0xd1   :  { %4371 = vmatprep.subr.bf16.mxu1 %v6724_v40  ;;  %6741 = vst [vmem:[#allocation28_spill] sm:$0xff] %v5868_v31 }
  0xd2   :  { %4465 = vmatpush3.bf16.msra.mxu0 %v5751_v7  ;;  %v6743_v7 = vand.u32 4294901760, %v5827_v63 }
  0xd3   :  { %4467 = vmatprep.subr.bf16.mxu0 %v5760_v9  ;;  %v6742_v9 = vand.u32 4294901760, %v5825_v14 }
  0xd4   :  { %4373 = vmatpush3.bf16.msra.mxu1 %v6727_v45 }
  0xd5   :  { %4375 = vmatprep.subr.bf16.mxu1 %v6728_v60 }
  0xd6   :  { %4469 = vmatpush3.bf16.msra.mxu0 %v5779_v51  ;;  %v5905_v51 = vsub.f32 %v5680_v61, %v6751_v26  ;;  %v6757_v61 = vand.u32 4294901760, %v5687_v54 }
  0xd7   :  { %4471 = vmatprep.subr.bf16.mxu0 %v5788_v36  ;;  %v5861_v36 = vsub.f32 %v45_v1, %v5830_v2  ;;  %v5877_v1 = vpack.c.bf16 %v6743_v7, %v6742_v9  ;;  %v6748_v7 = vand.u32 4294901760, %v5852_v55  ;;  %v6750_v2 = vand.u32 4294901760, %v5678_v38 }
  0xd8   :  { %4377 = vmatpush3.bf16.msra.mxu1 %v6731_v37  ;;  %v5927_v22 = vsub.f32 %v5687_v54, %v6757_v61 }
  0xd9   :  { %4379 = vmatprep.subr.bf16.mxu1 %v6732_v21  ;;  %6738 = vst [vmem:[#allocation27_spill] sm:$0xff] %v5861_v36  ;;  %6744 = vst [vmem:[#allocation13_spill] sm:$0xff] %v5877_v1  ;;  %v5900_v5 = vsub.f32 %v5678_v38, %v6750_v2  ;;  %v6755_v38 = vand.u32 4294901760, %v5861_v36 }
  0xda   :  { %4473 = vmatpush3.bf16.msra.mxu0 %v5807_v24  ;;  %v5850_v24 = vld [vmem:[#allocation5 + $0x260] sm:$0xff] }
  0xdb   :  { %4475 = vmatprep.subr.bf16.mxu0 %v5816_v48  ;;  %v6737_v48 = vld [vmem:[#allocation29_spill] sm:$0xff]  ;;  %v1995_v2 = vsub.f32 %v5861_v36, %v6755_v38  ;;  %v6761_v38 = vand.u32 4294901760, %v5689_v10  ;;  %v4522_v54 = vpack.c.bf16 %v5905_v51, %v5900_v5 }
  0xdc   :  { %4381 = vmatpush3.bf16.msra.mxu1 %v6736_v20 }
  0xdd   :  { %4383 = vmatprep.subr.bf16.mxu1 %v6737_v48  ;;  %v5939_v36 = vsub.f32 %v5689_v10, %v6761_v38  ;;  %v1996_v61 = vand.u32 4294901760, %v1995_v2  ;;  %v6766_v2 = vand.u32 4294901760, %v5712_v56 }
  0xde   :  { %4477 = vmatpush3.bf16.msra.mxu0 %v5837_v57  ;;  %v6756_v57 = vand.u32 4294901760, %v5685_v44 }
  0xdf   :  { %4479 = vmatprep.subr.bf16.mxu0 %v5846_v0  ;;  %v6747_v0 = vand.u32 4294901760, %v5850_v24 }
  0xe0   :  { %4385 = vmatpush3.bf16.msra.mxu1 %v6745_v35  ;;  %v5922_v26 = vsub.f32 %v5685_v44, %v6756_v57  ;;  %v6762_v44 = vand.u32 4294901760, %v5691_v34 }
  0xe1   :  { %4387 = vmatprep.subr.bf16.mxu1 %v6746_v19  ;;  %v5893_v9 = vpack.c.bf16 %v6748_v7, %v6747_v0  ;;  %v6753_v0 = vand.u32 4294901760, %v5857_v46 }
  0xe2   :  { %4481 = vmatpush3.bf16.msra.mxu0 %v5868_v31  ;;  %v6752_v31 = vand.u32 4294901760, %v5855_v58  ;;  %v5944_v57 = vsub.f32 %v5691_v34, %v6762_v44  ;;  %v4524_v38 = vpack.c.bf16 %v5927_v22, %v5922_v26  ;;  %v6765_v44 = vand.u32 4294901760, %v5710_v6 }
  0xe3   :  { %6749 = vst [vmem:[#allocation29_spill] sm:$0xff] %v5893_v9  ;;  %4483 = vmatprep.subr.bf16.mxu0 %v5877_v1 }
  0xe4   :  { %v5912_v7 = vpack.c.bf16 %v6753_v0, %v6752_v31  ;;  %4389 = vmatpush3.bf16.msra.mxu1 %v5311_v3  ;;  %v6758_v31 = vand.u32 4294901760, %v5881_v28  ;;  %v6759_v0 = vand.u32 4294901760, %v5883_v13 }
  0xe5   :  { %4391 = vmatprep.subr.bf16.mxu1 %v5330_v23 }
  0xe6   :  { %6754 = vst [vmem:[#allocation15_spill] sm:$0xff] %v5912_v7  ;;  %4485 = vmatpush3.bf16.msra.mxu0 %v5893_v9  ;;  %v5934_v1 = vpack.c.bf16 %v6759_v0, %v6758_v31  ;;  %v6763_v31 = vand.u32 4294901760, %v5706_v11  ;;  %v6764_v0 = vand.u32 4294901760, %v5708_v30 }
  0xe7   :  { %4487 = vmatprep.subr.bf16.mxu0 %v5912_v7 }
  0xe8   :  { %6760 = vst [vmem:[#allocation30_spill] sm:$0xff] %v5934_v1  ;;  %4393 = vmatpush3.bf16.msra.mxu1 %v5352_v53  ;;  %v5954_v10 = vsub.f32 %v5706_v11, %v6763_v31  ;;  %v5959_v34 = vsub.f32 %v5708_v30, %v6764_v0  ;;  %v5972_v11 = vsub.f32 %v5712_v56, %v6766_v2  ;;  %v6767_v31 = vand.u32 4294901760, %v6708_v42 }
  0xe9   :  { %4427 = vmatprep.subr.bf16.mxu1 %v6714_v17  ;;  %v5967_v17 = vsub.f32 %v5710_v6, %v6765_v44  ;;  %v4526_v30 = vpack.c.bf16 %v5944_v57, %v5939_v36  ;;  %v6768_v6 = vand.u32 4294901760, %v5733_v49  ;;  %v6769_v56 = vand.u32 4294901760, %v5735_v43 }
  0xea   :  { %4489 = vmatpush3.bf16.msra.mxu0 %v5934_v1  ;;  %v6774_v2 = vand.u32 4294901760, %v5769_v62 }
  0xeb   :  { %1613 = vmatmul.mubr.f32.vlgmr.msra.gmra.mrb[10].mxu1 %v6767_v31  ;;  %4523 = vmatprep.subr.bf16.mxu0 %v4522_v54  ;;  %v5984_v0 = vsub.f32 %v5733_v49, %v6768_v6  ;;  %v5989_v42 = vsub.f32 %v5735_v43, %v6769_v56  ;;  %v4528_v54 = vpack.c.bf16 %v5959_v34, %v5954_v10  ;;  %v6778_v56 = vand.u32 4294901760, %v5797_v41 }
  0xec   :  { %4429 = vmatpush3.bf16.msra.mxu1 %v6718_v32  ;;  %1883 = vmatprep.mubr.f32.mxu1 %v6707_v18  ;;  %v6770_v18 = vand.u32 4294901760, %v5738_v39  ;;  %v4530_v43 = vpack.c.bf16 %v5972_v11, %v5967_v17 }
  0xed   :  { %1997 = vmatmul.mubr.f32.vlgmr.msra.gmra.mrb[10].mxu0 %v1996_v61  ;;  %4431 = vmatprep.subr.bf16.mxu1 %v6720_v59  ;;  %v6771_v59 = vand.u32 4294901760, %v5740_v47  ;;  %v6772_v61 = vand.u32 4294901760, %v5764_v52 }
  0xee   :  { %4525 = vmatpush3.bf16.msra.mxu0 %v4524_v38  ;;  %2364 = vmatprep.mubr.f32.mxu0 %v5676_v50  ;;  %v5997_v32 = vsub.f32 %v5738_v39, %v6770_v18  ;;  %v6773_v39 = vand.u32 4294901760, %v5766_v15 }
  0xef   :  { %v6002_v49 = vsub.f32 %v5740_v47, %v6771_v59  ;;  %4527 = vmatprep.subr.bf16.mxu0 %v4526_v30  ;;  %v6011_v38 = vsub.f32 %v5764_v52, %v6772_v61  ;;  %v4532_v47 = vpack.c.bf16 %v5989_v42, %v5984_v0  ;;  %v6781_v59 = vand.u32 4294901760, %v5822_v4 }
  0xf0   :  { %4433 = vmatpush3.bf16.msra.mxu1 %v6723_v8  ;;  %v6016_v44 = vsub.f32 %v5766_v15, %v6773_v39  ;;  %v6023_v8 = vsub.f32 %v5769_v62, %v6774_v2  ;;  %v6776_v15 = vand.u32 4294901760, %v5792_v27  ;;  %v6777_v62 = vand.u32 4294901760, %v5794_v16 }
  0xf1   :  { %4435 = vmatprep.subr.bf16.mxu1 %v6724_v40  ;;  %v6775_v40 = vand.u32 4294901760, %v5771_v12  ;;  %v4534_v52 = vpack.c.bf16 %v6002_v49, %v5997_v32  ;;  %v2012_v39 = vand.u32 4294901760, %v5927_v22  ;;  %v6784_v2 = vand.u32 4294901760, %v5850_v24 }
  0xf2   :  { %4529 = vmatpush3.bf16.msra.mxu0 %v4528_v54  ;;  %v6037_v30 = vsub.f32 %v5792_v27, %v6776_v15  ;;  %v6042_v6 = vsub.f32 %v5794_v16, %v6777_v62  ;;  %v6780_v16 = vand.u32 4294901760, %v5820_v33  ;;  %v6785_v15 = vand.u32 4294901760, %v5852_v55 }
  0xf3   :  { %v6028_v31 = vsub.f32 %v5771_v12, %v6775_v40  ;;  %4531 = vmatprep.subr.bf16.mxu0 %v4530_v43  ;;  %v4536_v12 = vpack.c.bf16 %v6016_v44, %v6011_v38  ;;  %v6066_v43 = vsub.f32 %v5822_v4, %v6781_v59  ;;  %v6089_v40 = vsub.f32 %v5850_v24, %v6784_v2 }
  0xf4   :  { %4437 = vmatpush3.bf16.msra.mxu1 %v6727_v45  ;;  %v6049_v45 = vsub.f32 %v5797_v41, %v6778_v56  ;;  %v6061_v18 = vsub.f32 %v5820_v33, %v6780_v16  ;;  %v2117_v41 = vand.u32 4294901760, %v5900_v5  ;;  %v4540_v61 = vpack.c.bf16 %v6042_v6, %v6037_v30 }
  0xf5   :  { %4439 = vmatprep.subr.bf16.mxu1 %v6728_v60  ;;  %v6779_v60 = vand.u32 4294901760, %v5799_v29  ;;  %v4538_v27 = vpack.c.bf16 %v6028_v31, %v6023_v8  ;;  %v2005_v33 = vand.u32 4294901760, %v5922_v26  ;;  %v6096_v62 = vsub.f32 %v5852_v55, %v6785_v15 }
  0xf6   :  { %4533 = vmatpush3.bf16.msra.mxu0 %v4532_v47  ;;  %v6782_v47 = vand.u32 4294901760, %v5825_v14  ;;  %v4544_v24 = vpack.c.bf16 %v6066_v43, %v6061_v18  ;;  %v2118_v55 = vsub.f32 %v5900_v5, %v2117_v41  ;;  %v2026_v59 = vand.u32 4294901760, %v5959_v34 }
  0xf7   :  { %v6054_v54 = vsub.f32 %v5799_v29, %v6779_v60  ;;  %4535 = vmatprep.subr.bf16.mxu0 %v4534_v52  ;;  %v2124_v29 = vand.u32 4294901760, %v5905_v51  ;;  %v2006_v16 = vsub.f32 %v5922_v26, %v2005_v33  ;;  %v2145_v5 = vand.u32 4294901760, %v5967_v17 }
  0xf8   :  { %4441 = vmatpush3.bf16.msra.mxu1 %v6731_v37  ;;  %v6079_v4 = vsub.f32 %v5825_v14, %v6782_v47  ;;  %v6783_v37 = vand.u32 4294901760, %v5827_v63  ;;  %v6786_v14 = vand.u32 4294901760, %v5855_v58  ;;  %v6788_v47 = vand.u32 4294901760, %v5881_v28 }
  0xf9   :  { %4443 = vmatprep.subr.bf16.mxu1 %v6732_v21  ;;  %v4542_v52 = vpack.c.bf16 %v6054_v54, %v6049_v45  ;;  %v2125_v60 = vsub.f32 %v5905_v51, %v2124_v29  ;;  %v2152_v51 = vand.u32 4294901760, %v5972_v11  ;;  %v6789_v26 = vand.u32 4294901760, %v5883_v13 }
  0xfa   :  { %4537 = vmatpush3.bf16.msra.mxu0 %v4536_v12  ;;  %v6084_v21 = vsub.f32 %v5827_v63, %v6783_v37  ;;  %v6101_v12 = vsub.f32 %v5855_v58, %v6786_v14  ;;  %v6787_v63 = vand.u32 4294901760, %v5857_v46  ;;  %v2138_v58 = vand.u32 4294901760, %v5944_v57 }
  0xfb   :  { %4539 = vmatprep.subr.bf16.mxu0 %v4538_v27  ;;  %v2131_v27 = vand.u32 4294901760, %v5939_v36  ;;  %v4548_v37 = vpack.c.bf16 %v6096_v62, %v6089_v40  ;;  %v2126_v15 = vand.u32 4294901760, %v2125_v60  ;;  %v2153_v1 = vsub.f32 %v5972_v11, %v2152_v51 }
  0xfc   :  { %v6106_v56 = vsub.f32 %v5857_v46, %v6787_v63  ;;  %4445 = vmatpush3.bf16.msra.mxu1 %v6736_v20  ;;  %v2013_v46 = vsub.f32 %v5927_v22, %v2012_v39  ;;  %v2019_v20 = vand.u32 4294901760, %v5954_v10  ;;  %v6132_v22 = vsub.f32 %v5883_v13, %v6789_v26 }
  0xfd   :  { %4447 = vmatprep.subr.bf16.mxu1 %v6737_v48  ;;  %v4546_v48 = vpack.c.bf16 %v6084_v21, %v6079_v4  ;;  %v2139_v14 = vsub.f32 %v5944_v57, %v2138_v58  ;;  %v2007_v63 = vand.u32 4294901760, %v2006_v16  ;;  %v2146_v26 = vsub.f32 %v5967_v17, %v2145_v5 }
  0xfe   :  { %4541 = vmatpush3.bf16.msra.mxu0 %v4540_v61  ;;  %v6127_v61 = vsub.f32 %v5881_v28, %v6788_v47  ;;  %v4550_v2 = vpack.c.bf16 %v6106_v56, %v6101_v12  ;;  %v2132_v28 = vsub.f32 %v5939_v36, %v2131_v27  ;;  %v2014_v13 = vand.u32 4294901760, %v2013_v46 }
  0xff   :  { %4543 = vmatprep.subr.bf16.mxu0 %v4542_v52  ;;  %v2119_v52 = vand.u32 4294901760, %v2118_v55  ;;  %v2020_v47 = vsub.f32 %v5954_v10, %v2019_v20  ;;  %v2040_v55 = vand.u32 4294901760, %v5989_v42  ;;  %v2159_v57 = vand.u32 4294901760, %v5997_v32 }
 0x100   :  { %4449 = vmatpush3.bf16.msra.mxu1 %v6745_v35  ;;  %v2027_v35 = vsub.f32 %v5959_v34, %v2026_v59  ;;  %v4552_v36 = vpack.c.bf16 %v6132_v22, %v6127_v61  ;;  %v2166_v10 = vand.u32 4294901760, %v6002_v49  ;;  %v2133_v17 = vand.u32 4294901760, %v2132_v28 }
 0x101   :  { %4451 = vmatprep.subr.bf16.mxu1 %v6746_v19  ;;  %v2033_v19 = vand.u32 4294901760, %v5984_v0  ;;  %v4490_v34 = vpack.c.bf16 %v2126_v15, %v2119_v52  ;;  %v2140_v60 = vand.u32 4294901760, %v2139_v14  ;;  %v4492_v11 = vpack.c.bf16 %v2014_v13, %v2007_v63 }
 0x102   :  { %4545 = vmatpush3.bf16.msra.mxu0 %v4544_v24  ;;  %v4586_v24 = vpack.c.bf16 %v2124_v29, %v2117_v41  ;;  %v4588_v16 = vpack.c.bf16 %v2012_v39, %v2005_v33  ;;  %v2021_v46 = vand.u32 4294901760, %v2020_v47  ;;  %v2154_v7 = vand.u32 4294901760, %v2153_v1 }
 0x103   :  { %4547 = vmatprep.subr.bf16.mxu0 %v4546_v48  ;;  %v2028_v48 = vand.u32 4294901760, %v2027_v35  ;;  %v2034_v9 = vsub.f32 %v5984_v0, %v2033_v19  ;;  %v2041_v50 = vsub.f32 %v5989_v42, %v2040_v55  ;;  %v2167_v41 = vsub.f32 %v6002_v49, %v2166_v10 }
 0x104   :  { %4453 = vmatpush3.bf16.msra.mxu1 %v5311_v3  ;;  %v2147_v3 = vand.u32 4294901760, %v2146_v26  ;;  %v2047_v29 = vand.u32 4294901760, %v6011_v38  ;;  %v4494_v33 = vpack.c.bf16 %v2140_v60, %v2133_v17  ;;  %v4590_v39 = vpack.c.bf16 %v2138_v58, %v2131_v27 }
 0x105   :  { %4455 = vmatprep.subr.bf16.mxu1 %v5330_v23  ;;  %v2160_v23 = vsub.f32 %v5997_v32, %v2159_v57  ;;  %v2180_v1 = vand.u32 4294901760, %v6028_v31  ;;  %v4592_v0 = vpack.c.bf16 %v2026_v59, %v2019_v20  ;;  %v4594_v42 = vpack.c.bf16 %v2152_v51, %v2145_v5  ;;  %v6790_v20 = vld [vmem:[#allocation16_spill] sm:$0xff]  ;;  %v6791_v59 = vld [vmem:[#allocation27_spill] sm:$0xff] }
 0x106   :  { %4549 = vmatpush3.bf16.msra.mxu0 %v4548_v37  ;;  %v2054_v37 = vand.u32 4294901760, %v6016_v44  ;;  %v2068_v32 = vand.u32 4294901760, %v6042_v6  ;;  %v4496_v49 = vpack.c.bf16 %v2028_v48, %v2021_v46  ;;  %v4498_v52 = vpack.c.bf16 %v2154_v7, %v2147_v3 }
 0x107   :  { %4551 = vmatprep.subr.bf16.mxu0 %v4550_v2  ;;  %v2173_v2 = vand.u32 4294901760, %v6023_v8  ;;  %v2035_v15 = vand.u32 4294901760, %v2034_v9  ;;  %v2042_v28 = vand.u32 4294901760, %v2041_v50  ;;  %v2161_v27 = vand.u32 4294901760, %v2160_v23  ;;  %v6202_v23 = vld [vmem:[#allocation5 + $0x300] sm:$0xff] }
 0x108   :  { %4457 = vmatpush3.bf16.msra.mxu1 %v5352_v53  ;;  %v2061_v53 = vand.u32 4294901760, %v6037_v30  ;;  %v2168_v58 = vand.u32 4294901760, %v2167_v41  ;;  %v2048_v14 = vsub.f32 %v6011_v38, %v2047_v29  ;;  %v2055_v63 = vsub.f32 %v6016_v44, %v2054_v37  ;;  %v6204_v41 = vld [vmem:[#allocation5 + $0x308] sm:$0xff] }
 0x109   :  { %4491 = vmatprep.subr.bf16.mxu1 %v4490_v34  ;;  %v2174_v5 = vsub.f32 %v6023_v8, %v2173_v2  ;;  %v2187_v7 = vand.u32 4294901760, %v6049_v45  ;;  %v2194_v50 = vand.u32 4294901760, %v6054_v54  ;;  %v4596_v9 = vpack.c.bf16 %v2040_v55, %v2033_v19 }
 0x10a   :  { %4553 = vmatpush3.bf16.msra.mxu0 %v4552_v36  ;;  %v2062_v38 = vsub.f32 %v6037_v30, %v2061_v53  ;;  %v2069_v44 = vsub.f32 %v6042_v6, %v2068_v32  ;;  %v2075_v51 = vand.u32 4294901760, %v6061_v18  ;;  %v4500_v8 = vpack.c.bf16 %v2042_v28, %v2035_v15 }
 0x10b   :  { %1885 = vmatmul.mubr.f32.vlgmr.msra.gmra.mrb[12].mxu1 %v6716_v25  ;;  %4587 = vmatprep.subr.bf16.mxu0 %v4586_v24  ;;  %v2181_v25 = vsub.f32 %v6028_v31, %v2180_v1  ;;  %v4598_v31 = vpack.c.bf16 %v2166_v10, %v2159_v57  ;;  %v2082_v13 = vand.u32 4294901760, %v6066_v43  ;;  %v2201_v47 = vand.u32 4294901760, %v6079_v4 }
 0x10c   :  { %4493 = vmatpush3.bf16.msra.mxu1 %v4492_v11  ;;  %2227 = vmatprep.mubr.f32.mxu1 %v6790_v20  ;;  %v4502_v35 = vpack.c.bf16 %v2168_v58, %v2161_v27  ;;  %v2049_v26 = vand.u32 4294901760, %v2048_v14  ;;  %v2056_v19 = vand.u32 4294901760, %v2055_v63  ;;  %v2208_v55 = vand.u32 4294901760, %v6084_v21 }
 0x10d   :  { %2367 = vmatmul.mubr.f32.vlgmr.msra.gmra.mrb[12].mxu0 %v6791_v59  ;;  %4495 = vmatprep.subr.bf16.mxu1 %v4494_v33  ;;  %v2175_v36 = vand.u32 4294901760, %v2174_v5  ;;  %v2182_v34 = vand.u32 4294901760, %v2181_v25  ;;  %v2188_v24 = vsub.f32 %v6049_v45, %v2187_v7  ;;  %v2195_v57 = vsub.f32 %v6054_v54, %v2194_v50  ;;  %v6221_v25 = vld [vmem:[#allocation5 + $0x318] sm:$0xff] }
 0x10e   :  { %4589 = vmatpush3.bf16.msra.mxu0 %v4588_v16  ;;  %2641 = vmatprep.mubr.f32.mxu0 %v6790_v20  ;;  %v4600_v10 = vpack.c.bf16 %v2054_v37, %v2047_v29  ;;  %v2063_v17 = vand.u32 4294901760, %v2062_v38  ;;  %v2070_v60 = vand.u32 4294901760, %v2069_v44  ;;  %v2076_v11 = vsub.f32 %v6061_v18, %v2075_v51 }
 0x10f   :  { %4591 = vmatprep.subr.bf16.mxu0 %v4590_v39  ;;  %v2083_v16 = vsub.f32 %v6066_v43, %v2082_v13  ;;  %v2202_v46 = vsub.f32 %v6079_v4, %v2201_v47  ;;  %v2089_v48 = vand.u32 4294901760, %v6089_v40  ;;  %v2096_v3 = vand.u32 4294901760, %v6096_v62 }
 0x110   :  { %4497 = vmatpush3.bf16.msra.mxu1 %v4496_v49  ;;  %v4504_v29 = vpack.c.bf16 %v2056_v19, %v2049_v26  ;;  %v4602_v37 = vpack.c.bf16 %v2180_v1, %v2173_v2  ;;  %v2209_v33 = vsub.f32 %v6084_v21, %v2208_v55  ;;  %v2215_v39 = vand.u32 4294901760, %v6101_v12  ;;  %v6213_v2 = vld [vmem:[#allocation5 + $0x310] sm:$0xff] }
 0x111   :  { %4499 = vmatprep.subr.bf16.mxu1 %v4498_v52  ;;  %v2196_v49 = vand.u32 4294901760, %v2195_v57  ;;  %v2222_v52 = vand.u32 4294901760, %v6106_v56  ;;  %v4508_v15 = vpack.c.bf16 %v2070_v60, %v2063_v17  ;;  %v2077_v28 = vand.u32 4294901760, %v2076_v11  ;;  %v6247_v57 = vld [vmem:[#allocation5 + $0x320] sm:$0xff] }
 0x112   :  { %4593 = vmatpush3.bf16.msra.mxu0 %v4592_v0  ;;  %v4506_v0 = vpack.c.bf16 %v2182_v34, %v2175_v36  ;;  %v2753_v27 = vand.u32 4294901760, %v6202_v23  ;;  %v2756_v58 = vand.u32 4294901760, %v6204_v41  ;;  %v2084_v1 = vand.u32 4294901760, %v2083_v16 }
 0x113   :  { %4595 = vmatprep.subr.bf16.mxu0 %v4594_v42  ;;  %v2189_v42 = vand.u32 4294901760, %v2188_v24  ;;  %v2203_v14 = vand.u32 4294901760, %v2202_v46  ;;  %v2090_v63 = vsub.f32 %v6089_v40, %v2089_v48  ;;  %v2097_v5 = vsub.f32 %v6096_v62, %v2096_v3 }
 0x114   :  { %4501 = vmatpush3.bf16.msra.mxu1 %v4500_v8  ;;  %v2216_v38 = vsub.f32 %v6101_v12, %v2215_v39  ;;  %v2103_v44 = vand.u32 4294901760, %v6127_v61  ;;  %v2110_v8 = vand.u32 4294901760, %v6132_v22  ;;  %v2759_v26 = vand.u32 4294901760, %v6213_v2 }
 0x115   :  { %4503 = vmatprep.subr.bf16.mxu1 %v4502_v35  ;;  %v2223_v35 = vsub.f32 %v6106_v56, %v2222_v52  ;;  %v4604_v19 = vpack.c.bf16 %v2068_v32, %v2061_v53  ;;  %v6239_v36 = vsub.f32 %v6202_v23, %v2753_v27  ;;  %v6244_v34 = vsub.f32 %v6204_v41, %v2756_v58 }
 0x116   :  { %4597 = vmatpush3.bf16.msra.mxu0 %v4596_v9  ;;  %v2210_v9 = vand.u32 4294901760, %v2209_v33  ;;  %v2762_v24 = vand.u32 4294901760, %v6221_v25  ;;  %v4512_v30 = vpack.c.bf16 %v2084_v1, %v2077_v28  ;;  %v4606_v6 = vpack.c.bf16 %v2194_v50, %v2187_v7  ;;  %v150_v28 = vld [vmem:[#allocation5 + $0x330] sm:$0x7] }
 0x117   :  { %4599 = vmatprep.subr.bf16.mxu0 %v4598_v31  ;;  %v4510_v31 = vpack.c.bf16 %v2196_v49, %v2189_v42  ;;  %v2091_v53 = vand.u32 4294901760, %v2090_v63  ;;  %v2098_v32 = vand.u32 4294901760, %v2097_v5  ;;  %v2217_v60 = vand.u32 4294901760, %v2216_v38 }
 0x118   :  { %4505 = vmatpush3.bf16.msra.mxu1 %v4504_v29  ;;  %v4514_v17 = vpack.c.bf16 %v2210_v9, %v2203_v14  ;;  %v2104_v11 = vsub.f32 %v6127_v61, %v2103_v44  ;;  %v2111_v16 = vsub.f32 %v6132_v22, %v2110_v8  ;;  %v2224_v46 = vand.u32 4294901760, %v2223_v35  ;;  %v6792_v61 = vld [vmem:[#allocation18_spill] sm:$0xff] }
 0x119   :  { %4507 = vmatprep.subr.bf16.mxu1 %v4506_v0  ;;  %v6262_v45 = vsub.f32 %v6213_v2, %v2759_v26  ;;  %v2765_v54 = vand.u32 4294901760, %v6247_v57  ;;  %v4608_v29 = vpack.c.bf16 %v2082_v13, %v2075_v51  ;;  %v2837_v22 = vand.u32 4294901760, %v6239_v36 }
 0x11a   :  { %4601 = vmatpush3.bf16.msra.mxu0 %v4600_v10  ;;  %v6249_v10 = vld [vmem:[#allocation5 + $0x328] sm:$0xff]  ;;  %v6275_v33 = vsub.f32 %v6221_v25, %v2762_v24  ;;  %v4516_v42 = vpack.c.bf16 %v2098_v32, %v2091_v53  ;;  %v4610_v18 = vpack.c.bf16 %v2208_v55, %v2201_v47  ;;  %v4612_v43 = vpack.c.bf16 %v2096_v3, %v2089_v48 }
 0x11b   :  { %4603 = vmatprep.subr.bf16.mxu0 %v4602_v37  ;;  %v2768_v7 = vand.u32 4294901760, %v6249_v10  ;;  %v2844_v37 = vand.u32 4294901760, %v6244_v34  ;;  %v2105_v49 = vand.u32 4294901760, %v2104_v11  ;;  %v4518_v1 = vpack.c.bf16 %v2224_v46, %v2217_v60  ;;  %v6793_v32 = vld [vmem:[#allocation24_spill] sm:$0xff]  ;;  %v6794_v60 = vld [vmem:[#allocation19_spill] sm:$0xff]  ;;  %v6795_v11 = vld [vmem:[#allocation17_spill] sm:$0xff] }
 0x11c   :  { %4509 = vmatpush3.bf16.msra.mxu1 %v4508_v15  ;;  %v2112_v15 = vand.u32 4294901760, %v2111_v16  ;;  %v2851_v4 = vand.u32 4294901760, %v6262_v45  ;;  %v6291_v21 = vsub.f32 %v6247_v57, %v2765_v54  ;;  %v2838_v47 = vsub.f32 %v6239_v36, %v2837_v22  ;;  %v6797_v46 = vld [vmem:[#allocation11_spill] sm:$0xff] }
 0x11d   :  { %4511 = vmatprep.subr.bf16.mxu1 %v4510_v31  ;;  %v6296_v40 = vsub.f32 %v6249_v10, %v2768_v7  ;;  %v2845_v55 = vsub.f32 %v6244_v34, %v2844_v37  ;;  %v2858_v48 = vand.u32 4294901760, %v6275_v33  ;;  %v4614_v3 = vpack.c.bf16 %v2222_v52, %v2215_v39 }
 0x11e   :  { %v3326_v50 = vpop.f32.mrb[0].mxu1  ;;  %4605 = vmatpush3.bf16.msra.mxu0 %v4604_v19  ;;  %v164_v63 = vsel %vm162_vm0, %v150_v28, 0  ;;  %v4520_v5 = vpack.c.bf16 %v2112_v15, %v2105_v49  ;;  %v4616_v9 = vpack.c.bf16 %v2110_v8, %v2103_v44  ;;  %v2852_v38 = vsub.f32 %v6262_v45, %v2851_v4  ;;  %v47_v49 = vld [vmem:[#allocation2 + $0x30] sm:$0xff] }
 0x11f   :  { %v3327_v0 = vpop.f32.mrb[1].mxu1  ;;  %4607 = vmatprep.subr.bf16.mxu0 %v4606_v6  ;;  %v2865_v31 = vand.u32 4294901760, %v6291_v21  ;;  %v2872_v35 = vand.u32 4294901760, %v6296_v40  ;;  %v2839_v12 = vand.u32 4294901760, %v2838_v47  ;;  %v2846_v19 = vand.u32 4294901760, %v2845_v55  ;;  %v6801_v47 = vld [vmem:[#allocation21_spill] sm:$0xff] }
 0x120   :  { %v6285_v51 = vadd.f32 %v3327_v0, %v3326_v50  ;;  %4513 = vmatpush3.bf16.msra.mxu1 %v4512_v30  ;;  %v3396_v13 = vpop.f32.mrb[0].mxu0  ;;  %v2859_v56 = vsub.f32 %v6275_v33, %v2858_v48  ;;  %v6321_v39 = vand.u32 4294901760, %v164_v63  ;;  %v2853_v30 = vand.u32 4294901760, %v2852_v38  ;;  %v6804_v38 = vld [vmem:[#allocation25_spill] sm:$0xff] }
 0x121   :  { %4515 = vmatprep.subr.bf16.mxu1 %v4514_v17  ;;  %v3397_v14 = vpop.f32.mrb[1].mxu0  ;;  %v2866_v52 = vsub.f32 %v6291_v21, %v2865_v31  ;;  %v2873_v44 = vsub.f32 %v6296_v40, %v2872_v35  ;;  %v4660_v8 = vpack.c.bf16 %v2846_v19, %v2839_v12  ;;  %v4798_v17 = vmov 0.0|0.0   ;;  %v3293_v19 = vld [vmem:[%s6483_s2] ss:$0 sm:$0xff]  ;;  %s4801_s2 = smov [#allocation7]  }
 0x122   :  { %4609 = vmatpush3.bf16.msra.mxu0 %v4608_v29  ;;  %v6298_v62 = vadd.f32 %v3397_v14, %v3396_v13  ;;  %v2860_v6 = vand.u32 4294901760, %v2859_v56  ;;  %v6331_v53 = vsub.f32 %v164_v63, %v6321_v39  ;;  %v6796_v16 = vand.u32 4294901760, %v6795_v11  ;;  %v6799_v13 = vld [vmem:[#allocation20_spill] sm:$0xff]  ;;  %v6802_v63 = vld [vmem:[#allocation22_spill] sm:$0xff]  ;;  %s3283_s11 = sshll.u32 %s4801_s2, 4  ;;  %s3284_s11 = int_to_ptr.vmem [resolvable:$true] %s3283_s11 }
 0x123   :  { %4611 = vmatprep.subr.bf16.mxu0 %v4610_v18  ;;  %v2867_v29 = vand.u32 4294901760, %v2866_v52  ;;  %v2874_v0 = vand.u32 4294901760, %v2873_v44  ;;  %v4800_v18 = vmov 0.0   ;;  %v160_v14 = vsel %vm158_vm2, %v47_v49, 0  ;;  %v6805_v56 = vld [vmem:[#allocation26_spill] sm:$0xff]  ;;  %s4766_s12 = scalar_lea.vmem %s3284_s11, 128  ;;  %p4771_p3 = scmp.lt.s32.totalorder %s3284_s11, %s3284_s11 }
 0x124   :  { %4517 = vmatpush3.bf16.msra.mxu1 %v4516_v42  ;;  %v4663_v50 = vpack.c.bf16 %v2860_v6, %v2853_v30  ;;  %v2879_v42 = vand.u32 4294901760, %v6331_v53  ;;  %v4672_v12 = vpack.c.bf16 %v6275_v33, %v6262_v45  ;;  %v6806_v6 = vld [vmem:[#allocation28_spill] sm:$0xff]  ;;  %v4675_v11 = vpack.c.bf16 %v6296_v40, %v6291_v21  ;;  %p4767_p2 = scmp.ne.s32.totalorder %s3284_s11, %s4766_s12  ;;  %p4772_p4 = scmp.lt.s32.totalorder %s4766_s12, %s4766_s12 }
 0x125   :  { %4519 = vmatprep.subr.bf16.mxu1 %v4518_v1  ;;  %v4666_v15 = vpack.c.bf16 %v2874_v0, %v2867_v29  ;;  %v6800_v1 = vld [vmem:[#allocation12_spill] sm:$0xff]  ;;  %v4654_v23 = vpack.c.bf16 %v2762_v24, %v2759_v26  ;;  %v6811_v41 = vand.u32 4294901760, %v6791_v59  ;;  %v4693_v2 = vpack.c.bf16 %v2872_v35, %v2865_v31 }
 0x126   :  { %4613 = vmatpush3.bf16.msra.mxu0 %v4612_v43  ;;  %v6798_v43 = vld [vmem:[#allocation14_spill] sm:$0xff]  ;;  %v2880_v28 = vsub.f32 %v6331_v53, %v2879_v42  ;;  %p4773_p5 = por %p4772_p4, %p4771_p3 }
 0x127   :  { %4615 = vmatprep.subr.bf16.mxu0 %v4614_v3  ;;  %v6353_v3 = vand.u32 4294901760, %v160_v14 }
 0x128   :  { %4521 = vmatpush3.bf16.msra.mxu1 %v4520_v5  ;;  %v2881_v55 = vand.u32 4294901760, %v2880_v28  ;;  %v4669_v5 = vpack.c.bf16 %v6244_v34, %v6239_v36  ;;  %v6809_v28 = vld [vmem:[#allocation15_spill] sm:$0xff]  ;;  %p4774_p6 = pnand %p4773_p5, %p4767_p2 }
 0x129   :  { %4555 = vmatprep.subr.bf16.mxu1 %v6792_v61 }
 0x12a   :  { %4617 = vmatpush3.bf16.msra.mxu0 %v4616_v9  ;;  %v6803_v9 = vld [vmem:[#allocation23_spill] sm:$0xff] }
 0x12b   :  { %2229 = vmatmul.mubr.f32.vlgmr.msra.gmra.mrb[14].mxu1 %v6793_v32  ;;  %4659 = vmatprep.subr.bf16.mxu0 %v4798_v17 }
 0x12c   :  { %4557 = vmatpush3.bf16.msra.mxu1 %v6794_v60  ;;  %2471 = vmatprep.mubr.f32.mxu1 %v6796_v16 }
 0x12d   :  { %2643 = vmatmul.mubr.f32.vlgmr.msra.gmra.mrb[14].mxu0 %v6793_v32  ;;  %4559 = vmatprep.subr.bf16.mxu1 %v6797_v46 }
 0x12e   :  { %4661 = vmatpush3.bf16.msra.mxu0 %v4660_v8  ;;  %4003 = vmatprep.mubr.msk.f32.mxu0 %vm4799_vm1, %v4800_v18  ;;  %v275_v8 = vadd.f32 %v6285_v51, %v3293_v19 }
 0x12f   :  { %4662 = vmatprep.subr.bf16.mxu0 %v4798_v17 }
 0x130   :  { %4561 = vmatpush3.bf16.msra.mxu1 %v6798_v43 }
 0x131   :  { %4563 = vmatprep.subr.bf16.mxu1 %v6799_v13 }
 0x132   :  { %4664 = vmatpush3.bf16.msra.mxu0 %v4663_v50  ;;  %v6807_v50 = vld [vmem:[#allocation13_spill] sm:$0xff] }
 0x133   :  { %4665 = vmatprep.subr.bf16.mxu0 %v4798_v17 }
 0x134   :  { %4565 = vmatpush3.bf16.msra.mxu1 %v6800_v1 }
 0x135   :  { %4567 = vmatprep.subr.bf16.mxu1 %v6801_v47 }
 0x136   :  { %4667 = vmatpush3.bf16.msra.mxu0 %v4666_v15  ;;  %v6808_v15 = vld [vmem:[#allocation29_spill] sm:$0xff] }
 0x137   :  { %4001 = vmatprep.subr.mxu0 %v4800_v18 }
 0x138   :  { %4569 = vmatpush3.bf16.msra.mxu1 %v6802_v63 }
 0x139   :  { %4571 = vmatprep.subr.bf16.mxu1 %v6803_v9 }
 0x13a   :  { %4002 = vmatpush3.msra.mxu0 %v2881_v55  ;;  %v6382_v55 = vsub.f32 %v160_v14, %v6353_v3 }
 0x13b   :  { %4668 = vmatprep.subr.bf16.mxu0 %v4798_v17  ;;  %4004 = vmatmul.mubr.f32.vlgmr.msra.gmra.mrb[16].mxu0 %v6353_v3 }
 0x13c   :  { %4573 = vmatpush3.bf16.msra.mxu1 %v6804_v38  ;;  %4670 = vmatpush3.bf16.msra.mxu0 %v4669_v5  ;;  %v6388_v5 = vpack.c.bf16 %v2756_v58, %v2753_v27  ;;  %v4657_v27 = vpack.c.bf16 %v2768_v7, %v2765_v54  ;;  %v2826_v59 = vand.u32 4294901760, %v6382_v55  ;;  %v4690_v58 = vpack.c.bf16 %v2858_v48, %v2851_v4 }
 0x13d   :  { %4575 = vmatprep.subr.bf16.mxu1 %v6805_v56  ;;  %4671 = vmatprep.subr.bf16.mxu0 %v4798_v17 }
 0x13e   :  { %v3361_v52 = vpop.f32.mrb[2].mxu1  ;;  %4020 = vmatprep.mubr.msk.f32.mxu0 %vm4799_vm1, %v4800_v18  ;;  %v2827_v54 = vsub.f32 %v6382_v55, %v2826_v59 }
 0x13f   :  { %v3362_v44 = vpop.f32.mrb[3].mxu1 }
 0x140   :  { %v3363_v30 = vadd.f32 %v3362_v44, %v3361_v52  ;;  %4577 = vmatpush3.bf16.msra.mxu1 %v6806_v6  ;;  %4673 = vmatpush3.bf16.msra.mxu0 %v4672_v12  ;;  %v3466_v16 = vpop.f32.mrb[2].mxu0  ;;  %v6810_v12 = vld [vmem:[#allocation30_spill] sm:$0xff]  ;;  %v2828_v7 = vand.u32 4294901760, %v2827_v54 }
 0x141   :  { %4579 = vmatprep.subr.bf16.mxu1 %v6807_v50  ;;  %4674 = vmatprep.subr.bf16.mxu0 %v4798_v17  ;;  %v3467_v29 = vpop.f32.mrb[3].mxu0 }
 0x142   :  { %v507_v0 = vadd.f32 %v3363_v30, %v275_v8  ;;  %v3468_v49 = vadd.f32 %v3467_v29, %v3466_v16 }
 0x144   :  { %4581 = vmatpush3.bf16.msra.mxu1 %v6808_v15  ;;  %4676 = vmatpush3.bf16.msra.mxu0 %v4675_v11  ;;  %v645_v51 = vadd.f32 %v6298_v62, %v507_v0 }
 0x145   :  { %4583 = vmatprep.subr.bf16.mxu1 %v6809_v28  ;;  %4018 = vmatprep.subr.mxu0 %v4800_v18 }
 0x148   :  { %4585 = vmatpush3.bf16.msra.mxu1 %v6810_v12  ;;  %4019 = vmatpush3.msra.mxu0 %v6331_v53 }
 0x149   :  { %4677 = vmatprep.subr.bf16.mxu0 %v4798_v17  ;;  %4021 = vmatmul.mubr.f32.vlgmr.msra.gmra.mrb[16].mxu0 %v6382_v55 }
 0x14a   :  { %4679 = vmatpush3.bf16.msra.mxu0 %v6388_v5  ;;  %4619 = vmatprep.subr.bf16.mxu1 %v6792_v61 }
 0x14b   :  { %2475 = vmatmul.mubr.f32.vlgmr.msra.gmra.mrb[16].mxu1 %v6811_v41  ;;  %4680 = vmatprep.subr.bf16.mxu0 %v4798_v17 }
 0x14c   :  { %4621 = vmatpush3.bf16.msra.mxu1 %v6794_v60  ;;  %4037 = vmatprep.mubr.msk.f32.mxu0 %vm4799_vm1, %v4800_v18 }
 0x14d   :  { %4623 = vmatprep.subr.bf16.mxu1 %v6797_v46  ;;  %2745 = vmatprep.mubr.f32.mxu1 %v6790_v20  ;;  %v4687_v20 = vpack.c.bf16 %v2844_v37, %v2837_v22 }
 0x14e   :  { %4682 = vmatpush3.bf16.msra.mxu0 %v4654_v23 }
 0x14f   :  { %4683 = vmatprep.subr.bf16.mxu0 %v4798_v17 }
 0x150   :  { %4625 = vmatpush3.bf16.msra.mxu1 %v6798_v43 }
 0x151   :  { %4627 = vmatprep.subr.bf16.mxu1 %v6799_v13 }
 0x152   :  { %4685 = vmatpush3.bf16.msra.mxu0 %v4657_v27 }
 0x153   :  { %4035 = vmatprep.subr.mxu0 %v4800_v18 }
 0x154   :  { %4629 = vmatpush3.bf16.msra.mxu1 %v6800_v1 }
 0x155   :  { %4631 = vmatprep.subr.bf16.mxu1 %v6801_v47 }
 0x156   :  { %4036 = vmatpush3.msra.mxu0 %v6321_v39 }
 0x157   :  { %4686 = vmatprep.subr.bf16.mxu0 %v4798_v17  ;;  %4038 = vmatmul.mubr.f32.vlgmr.msra.gmra.mrb[16].mxu0 %v2826_v59 }
 0x158   :  { %4633 = vmatpush3.bf16.msra.mxu1 %v6802_v63  ;;  %4688 = vmatpush3.bf16.msra.mxu0 %v4687_v20 }
 0x159   :  { %4635 = vmatprep.subr.bf16.mxu1 %v6803_v9  ;;  %4689 = vmatprep.subr.bf16.mxu0 %v4798_v17 }
 0x15a   :  { %4054 = vmatprep.mubr.msk.f32.mxu0 %vm4799_vm1, %v4800_v18 }
 0x15c   :  { %4637 = vmatpush3.bf16.msra.mxu1 %v6804_v38  ;;  %4691 = vmatpush3.bf16.msra.mxu0 %v4690_v58 }
 0x15d   :  { %4639 = vmatprep.subr.bf16.mxu1 %v6805_v56  ;;  %4692 = vmatprep.subr.bf16.mxu0 %v4798_v17 }
 0x15e   :  { %v3431_v25 = vpop.f32.mrb[4].mxu1 }
 0x15f   :  { %v3432_v26 = vpop.f32.mrb[5].mxu1 }
 0x160   :  { %v3433_v36 = vadd.f32 %v3432_v26, %v3431_v25  ;;  %4641 = vmatpush3.bf16.msra.mxu1 %v6806_v6  ;;  %4694 = vmatpush3.bf16.msra.mxu0 %v4693_v2  ;;  %v3536_v34 = vpop.f32.mrb[4].mxu0 }
 0x161   :  { %4643 = vmatprep.subr.bf16.mxu1 %v6807_v50  ;;  %4052 = vmatprep.subr.mxu0 %v4800_v18  ;;  %v3537_v24 = vpop.f32.mrb[5].mxu0 }
 0x162   :  { %v753_v57 = vadd.f32 %v3433_v36, %v645_v51  ;;  %v3538_v10 = vadd.f32 %v3537_v24, %v3536_v34 }
 0x164   :  { %4645 = vmatpush3.bf16.msra.mxu1 %v6808_v15  ;;  %4053 = vmatpush3.msra.mxu0 %v2879_v42  ;;  %v921_v45 = vadd.f32 %v3468_v49, %v753_v57 }
 0x165   :  { %4695 = vmatprep.subr.bf16.mxu0 %v4798_v17  ;;  %4055 = vmatmul.mubr.f32.vlgmr.msra.gmra.mrb[16].mxu0 %v6353_v3 }
 0x166   :  { %4697 = vmatpush3.bf16.msra.mxu0 %v6388_v5  ;;  %4647 = vmatprep.subr.bf16.mxu1 %v6809_v28 }
 0x167   :  { %4698 = vmatprep.subr.bf16.mxu0 %v4798_v17  ;;  %4071 = vmatprep.mubr.msk.f32.mxu0 %vm4799_vm1, %v4800_v18 }
 0x168   :  { %4649 = vmatpush3.bf16.msra.mxu1 %v6810_v12 }
 0x169   :  { %4650 = vmatprep.subr.bf16.mxu1 %v4798_v17 }
 0x16a   :  { %4700 = vmatpush3.bf16.msra.mxu0 %v4654_v23 }
 0x16b   :  { %2747 = vmatmul.mubr.f32.vlgmr.msra.gmra.mrb[18].mxu1 %v6793_v32  ;;  %4701 = vmatprep.subr.bf16.mxu0 %v4798_v17 }
 0x16c   :  { %4652 = vmatpush3.bf16.msra.mxu1 %v6388_v5  ;;  %3986 = vmatprep.mubr.msk.f32.mxu1 %vm4799_vm1, %v4800_v18 }
 0x16d   :  { %4653 = vmatprep.subr.bf16.mxu1 %v4798_v17 }
 0x16e   :  { %4703 = vmatpush3.bf16.msra.mxu0 %v4657_v27 }
 0x16f   :  { %4069 = vmatprep.subr.mxu0 %v4800_v18 }
 0x170   :  { %4655 = vmatpush3.bf16.msra.mxu1 %v4654_v23 }
 0x171   :  { %4656 = vmatprep.subr.bf16.mxu1 %v4798_v17 }
 0x172   :  { %4070 = vmatpush3.msra.mxu0 %v6321_v39 }
 0x173   :  { %4072 = vmatmul.mubr.f32.vlgmr.msra.gmra.mrb[16].mxu0 %v6353_v3 }
 0x174   :  { %4658 = vmatpush3.bf16.msra.mxu1 %v4657_v27 }
 0x175   :  { %3984 = vmatprep.subr.mxu1 %v4800_v18 }
 0x178   :  { %3985 = vmatpush3.msra.mxu1 %v6321_v39 }
 0x179   :  { %3987 = vmatmul.mubr.f32.vlgmr.msra.gmra.mrb[20].mxu1 %v2828_v7 }
 0x17e   :  { %v3501_v22 = vpop.f32.mrb[6].mxu1 }
 0x17f   :  { %v3502_v37 = vpop.f32.mrb[7].mxu1 }
 0x180   :  { %v3503_v33 = vadd.f32 %v3502_v37, %v3501_v22  ;;  %v3606_v4 = vpop.f32.mrb[6].mxu0 }
 0x181   :  { %v3607_v21 = vpop.f32.mrb[7].mxu0 }
 0x182   :  { %v1025_v40 = vadd.f32 %v3503_v33, %v921_v45  ;;  %v3608_v62 = vadd.f32 %v3607_v21, %v3606_v4 }
 0x184   :  { %v1137_v48 = vadd.f32 %v3538_v10, %v1025_v40 }
 0x19e   :  { %v3571_v31 = vpop.f32.mrb[8].mxu1 }
 0x19f   :  { %v3572_v35 = vpop.f32.mrb[9].mxu1 }
 0x1a0   :  { %v3573_v61 = vadd.f32 %v3572_v35, %v3571_v31  ;;  %v3676_v53 = vpop.f32.mrb[8].mxu0 }
 0x1a1   :  { %v3677_v32 = vpop.f32.mrb[9].mxu0 }
 0x1a2   :  { %v1369_v17 = vadd.f32 %v3573_v61, %v1137_v48  ;;  %v3678_v60 = vadd.f32 %v3677_v32, %v3676_v53 }
 0x1a4   :  { %v1507_v46 = vadd.f32 %v3608_v62, %v1369_v17 }
 0x1be   :  { %v3641_v42 = vpop.f32.mrb[10].mxu1 }
 0x1bf   :  { %v3642_v18 = vpop.f32.mrb[11].mxu1 }
 0x1c0   :  { %v3643_v39 = vadd.f32 %v3642_v18, %v3641_v42  ;;  %v3746_v43 = vpop.f32.mrb[10].mxu0 }
 0x1c1   :  { %v3747_v13 = vpop.f32.mrb[11].mxu0 }
 0x1c2   :  { %v1615_v1 = vadd.f32 %v3643_v39, %v1507_v46  ;;  %v3748_v14 = vadd.f32 %v3747_v13, %v3746_v43 }
 0x1c4   :  { %v1783_v47 = vadd.f32 %v3678_v60, %v1615_v1 }
 0x1de   :  { %v3711_v3 = vpop.f32.mrb[12].mxu1 }
 0x1df   :  { %v3712_v63 = vpop.f32.mrb[13].mxu1 }
 0x1e0   :  { %v3713_v9 = vadd.f32 %v3712_v63, %v3711_v3  ;;  %v3816_v38 = vpop.f32.mrb[12].mxu0 }
 0x1e1   :  { %v3817_v19 = vpop.f32.mrb[13].mxu0 }
 0x1e2   :  { %v1887_v56 = vadd.f32 %v3713_v9, %v1783_v47  ;;  %v3818_v52 = vadd.f32 %v3817_v19, %v3816_v38 }
 0x1e4   :  { %v1999_v44 = vadd.f32 %v3748_v14, %v1887_v56 }
 0x1fe   :  { %v3781_v8 = vpop.f32.mrb[14].mxu1 }
 0x1ff   :  { %v3782_v30 = vpop.f32.mrb[15].mxu1 }
 0x200   :  { %v3783_v6 = vadd.f32 %v3782_v30, %v3781_v8  ;;  %v3886_v11 = vpop.f32.mrb[14].mxu0 }
 0x201   :  { %v3887_v16 = vpop.f32.mrb[15].mxu0 }
 0x202   :  { %v2231_v50 = vadd.f32 %v3783_v6, %v1999_v44  ;;  %v3888_v29 = vadd.f32 %v3887_v16, %v3886_v11 }
 0x204   :  { %v2369_v0 = vadd.f32 %v3818_v52, %v2231_v50 }
 0x21e   :  { %v3851_v49 = vpop.f32.mrb[16].mxu1 }
 0x21f   :  { %v3852_v15 = vpop.f32.mrb[17].mxu1 }
 0x220   :  { %v3853_v51 = vadd.f32 %v3852_v15, %v3851_v49 }
 0x222   :  { %v2477_v28 = vadd.f32 %v3853_v51, %v2369_v0 }
 0x224   :  { %v2645_v55 = vadd.f32 %v3888_v29, %v2477_v28 }
 0x23e   :  { %v3921_v5 = vpop.f32.mrb[18].mxu1 }
 0x23f   :  { %v3922_v12 = vpop.f32.mrb[19].mxu1 }
 0x240   :  { %v3923_v23 = vadd.f32 %v3922_v12, %v3921_v5 }
 0x242   :  { %v2749_v41 = vadd.f32 %v3923_v23, %v2645_v55 }
 0x246   :  { %v3272_v27 = vpop.f32.mrb[16].mxu0 }
 0x247   :  { %v4073_v59 = vpop.f32.mrb[17].mxu0 }
 0x24c   :  { %v2830_v20 = vpop.f32.mrb[20].mxu1 }
 0x24d   :  { %v2831_v58 = vadd.f32 %v2830_v20, %v2749_v41  ;;  %v3988_v2 = vpop.f32.mrb[21].mxu1 }
 0x24f   :  { %v4705_v25 = vadd.f32 %v3272_v27, %v2831_v58 }
 0x251   :  { %3276 = vst [vmem:[#allocation7] sm:$0xff] %v4705_v25 }
 0x252   :  { %4777 = shalt.err (!%p4774_p6)
}
 0x253   :  { %s4778_s15 = scalar_lea.hbm %s6484_s3, 128 }
 0x254   :  { %p4779_p7 = scmp.ne.s32.totalorder %s6484_s3, %s4778_s15  ;;  %p4782_p8 = scmp.lt.u32.totalorder %s4778_s15, %s6484_s3 }
 0x256   :  { %p4784_p9 = pnand %p4782_p8, %p4779_p7 }
 0x258   :  { %4787 = shalt.err (!%p4784_p9)
}
 0x259   :  { %3286 = dma.vmem_to_hbm [thread:$0]  %s3284_s11, 128, %s6484_s3, [#allocation4]  }
 0x25a   :  { %4792 = dma.done.wait [#allocation4], 128  }
 0x25b   :  { %4793 = vsyncadd [#allocation4], 4294967168 }
 0x25c   :  { %3290 = vsyncpa [#allocation3], 1 }
 0x25d   :  { %3291 = vsyncpa [#allocation6], 1 }
 0x25e   :  { %3292 = vsyncpa [#allocation4], 1 }

</bundles_post_ra>
